<compile_context>
chip_gen: v5e
topology: v5e:2x2
jax: 0.10.0
libtpu: 0.0.40
codegen_flags: <defaults>
</compile_context>

<pallas_src>
import jax
import jax.numpy as jnp
from jax.experimental import pallas as pl
from jax.experimental.pallas import tpu as pltpu


def lstm_recurrence_kernel(gx_ref, whh_ref, h_all_ref):
    """Single-invocation recurrence kernel.

    gx_ref    : (T, 4, B, H)  precomputed x @ W_ih^T + bias, per gate, f32
    whh_ref   : (4, H, H)     per-gate recurrent weights (f32 or bf16)
    h_all_ref : (T, B, H)     hidden state per time step (f32), VMEM-resident,
                              written back to HBM once at the end.
    """
    T, _, B, H = gx_ref.shape
    mm_dtype = whh_ref.dtype

    # Hoist the (small) recurrent weights into values once, outside the loop.
    w_i = whh_ref[0]
    w_f = whh_ref[1]
    w_g = whh_ref[2]
    w_o = whh_ref[3]

    def step(t, carry):
        h_prev, c_prev = carry                      # f32 loop carries (vregs)
        hp = h_prev.astype(mm_dtype)
        gx = gx_ref[t]                              # (4, B, H) for this step

        # Only the truly recurrent (B,H)x(H,H) matmuls remain on the
        # sequential critical path; each gate stays (B,H)-aligned with h/c.
        i_g = jax.nn.sigmoid(
            gx[0] + jnp.dot(hp, w_i, preferred_element_type=jnp.float32))
        f_g = jax.nn.sigmoid(
            gx[1] + jnp.dot(hp, w_f, preferred_element_type=jnp.float32))
        g_g = jnp.tanh(
            gx[2] + jnp.dot(hp, w_g, preferred_element_type=jnp.float32))
        o_g = jax.nn.sigmoid(
            gx[3] + jnp.dot(hp, w_o, preferred_element_type=jnp.float32))

        c = f_g * c_prev + i_g * g_g
        h = o_g * jnp.tanh(c)

        h_all_ref[t] = h                            # VMEM store; one HBM DMA at end
        return (h, c)

    h0 = jnp.zeros((B, H), jnp.float32)
    c0 = jnp.zeros((B, H), jnp.float32)
    jax.lax.fori_loop(0, T, step, (h0, c0), unroll=(T <= 16))


def simple_lstm_forward(x, params, *, matmul_dtype=jnp.float32):
    """x: (B, T, D) float32, batch_first like the PyTorch module. Returns (B, T, O)."""
    B, T, D = x.shape
    H = params["w_hh"].shape[1]
    O = params["w_lin"].shape[0]

    # ---- Hoisted input projection: one big matmul, gate axis made explicit.
    # Layout (T, 4, B, H); the batch_first -> time-major transpose is folded
    # into the einsum (no separate HBM transpose pass for x).
    wih_kh = params["w_ih"].T.reshape(D, 4, H).astype(matmul_dtype)       # (D,4,H)
    b_sum = (params["b_ih"] + params["b_hh"]).reshape(4, H).astype(jnp.float32)
    gx = jnp.einsum("btd,dkh->tkbh", x.astype(matmul_dtype), wih_kh,
                    preferred_element_type=jnp.float32)
    gx = (gx + b_sum[None, :, None, :]).astype(jnp.float32)               # (T,4,B,H)

    # ---- Per-gate recurrent weights, gate order i, f, g, o.
    whh_pg = jnp.transpose(params["w_hh"].T.reshape(H, 4, H), (1, 0, 2))  # (4,H,H)
    whh_pg = whh_pg.astype(matmul_dtype)

    # ---- Single-invocation recurrence kernel (everything VMEM-resident).
    h_all = pl.pallas_call(
        lstm_recurrence_kernel,
        out_shape=jax.ShapeDtypeStruct((T, B, H), jnp.float32),
        grid_spec=pltpu.PrefetchScalarGridSpec(
            num_scalar_prefetch=0,
            grid=(1,),
            in_specs=[
                pl.BlockSpec((T, 4, B, H), lambda i: (0, 0, 0, 0)),  # gates_x
                pl.BlockSpec((4, H, H), lambda i: (0, 0, 0)),        # W_hh per gate
            ],
            out_specs=pl.BlockSpec((T, B, H), lambda i: (0, 0, 0)),
        ),
        compiler_params=pltpu.CompilerParams(
            dimension_semantics=("arbitrary",),       # recurrence is sequential
            vmem_limit_bytes=32 * 1024 * 1024,        # safe on v5e/v6e/v7x budgets
        ),
    )(gx, whh_pg)                                     # (T, B, H)

    # ---- Hoisted Linear head: one lane-efficient matmul; the transpose back to
    # batch_first (B, T, O) is folded into the einsum.
    y = jnp.einsum("tbh,ho->bto", h_all,
                   params["w_lin"].T.astype(jnp.float32),
                   preferred_element_type=jnp.float32) + params["b_lin"]
    return y


def init_params(key, input_size, hidden_size, output_size):
    """Deterministic PyTorch-style init: U(-1/sqrt(H), 1/sqrt(H))."""
    ks = jax.random.split(key, 6)
    klstm = 1.0 / jnp.sqrt(hidden_size)
    klin = 1.0 / jnp.sqrt(hidden_size)
    return {
        "w_ih": jax.random.uniform(ks[0], (4 * hidden_size, input_size),
                                   jnp.float32, -klstm, klstm),
        "w_hh": jax.random.uniform(ks[1], (4 * hidden_size, hidden_size),
                                   jnp.float32, -klstm, klstm),
        "b_ih": jax.random.uniform(ks[2], (4 * hidden_size,),
                                   jnp.float32, -klstm, klstm),
        "b_hh": jax.random.uniform(ks[3], (4 * hidden_size,),
                                   jnp.float32, -klstm, klstm),
        "w_lin": jax.random.uniform(ks[4], (output_size, hidden_size),
                                    jnp.float32, -klin, klin),
        "b_lin": jax.random.uniform(ks[5], (output_size,),
                                    jnp.float32, -klin, klin),
    }


def reference_forward(x, params):
    """Pure-JAX reference for numerical validation (torch.nn.LSTM semantics)."""
    B, T, D = x.shape
    H = params["w_hh"].shape[1]
    wih_t = params["w_ih"].T
    whh_t = params["w_hh"].T
    b = params["b_ih"] + params["b_hh"]

    def step(carry, x_t):
        h, c = carry
        gates = x_t @ wih_t + h @ whh_t + b
        i = jax.nn.sigmoid(gates[:, 0:H])
        f = jax.nn.sigmoid(gates[:, H:2 * H])
        g = jnp.tanh(gates[:, 2 * H:3 * H])
        o = jax.nn.sigmoid(gates[:, 3 * H:4 * H])
        c = f * c + i * g
        h = o * jnp.tanh(c)
        return (h, c), h

    h0 = jnp.zeros((B, H), jnp.float32)
    c0 = jnp.zeros((B, H), jnp.float32)
    _, hs = jax.lax.scan(step, (h0, c0), jnp.transpose(x, (1, 0, 2)))
    hs = jnp.transpose(hs, (1, 0, 2))                       # (B, T, H)
    return hs @ params["w_lin"].T + params["b_lin"]


if __name__ == "__main__":
    B, T = 2, 8
    input_size, hidden_size, output_size = 16, 32, 8

    key = jax.random.PRNGKey(0)
    kx, kp = jax.random.split(key)
    x = jax.random.normal(kx, (B, T, input_size), jnp.float32)
    params = init_params(kp, input_size, hidden_size, output_size)

    y_ref = reference_forward(x, params)

    # f32 matmul path: tight check against the pure-JAX reference.
    y32 = simple_lstm_forward(x, params, matmul_dtype=jnp.float32)
    jax.block_until_ready(y32)
    assert y32.shape == (B, T, output_size)
    assert jnp.allclose(y32, y_ref, atol=1e-4, rtol=1e-4), "f32 mismatch vs reference"

    # bf16 matmul path (MXU-native operands, f32 accumulation and f32 h/c state);
    # validated against the f32 reference at a looser tolerance per review.
    ybf = simple_lstm_forward(x, params, matmul_dtype=jnp.bfloat16)
    jax.block_until_ready(ybf)
    assert ybf.shape == (B, T, output_size)
    assert jnp.allclose(ybf, y_ref, atol=5e-2, rtol=5e-2), "bf16 mismatch vs reference"

    print("KERNEL_OK")
</pallas_src>

<mosaic_0001>
module attributes {stable_mosaic.version = 11 : i64} {
  func.func @lstm_recurrence_kernel(%arg0: i32, %arg1: memref<8x4x2x32xf32, #tpu.memory_space<vmem>>, %arg2: memref<4x32x32xf32, #tpu.memory_space<vmem>>, %arg3: memref<8x2x32xf32, #tpu.memory_space<vmem>>) attributes {dimension_semantics = [#tpu.dimension_semantics<arbitrary>], iteration_bounds = array<i64: 1>, scalar_prefetch = 0 : i64, scratch_operands = 0 : i64, tpu.core_type = #tpu.core_type<tc>, window_params = [{pipeline_mode = #tpu.pipeline_mode<synchronous>, transform_indices = @transform_0, window_bounds = array<i64: 8, 4, 2, 32>}, {pipeline_mode = #tpu.pipeline_mode<synchronous>, transform_indices = @transform_1, window_bounds = array<i64: 4, 32, 32>}, {pipeline_mode = #tpu.pipeline_mode<synchronous>, transform_indices = @transform_2, window_bounds = array<i64: 8, 2, 32>}]} {
    %c0 = arith.constant 0 : index
    %c0_0 = arith.constant 0 : index
    %c0_1 = arith.constant 0 : index
    %0 = vector.load %arg2[%c0, %c0_0, %c0_1] : memref<4x32x32xf32, #tpu.memory_space<vmem>>, vector<1x32x32xf32>
    %1 = vector.shape_cast %0 : vector<1x32x32xf32> to vector<32x32xf32>
    %c1 = arith.constant 1 : index
    %c0_2 = arith.constant 0 : index
    %c0_3 = arith.constant 0 : index
    %2 = vector.load %arg2[%c1, %c0_2, %c0_3] : memref<4x32x32xf32, #tpu.memory_space<vmem>>, vector<1x32x32xf32>
    %3 = vector.shape_cast %2 : vector<1x32x32xf32> to vector<32x32xf32>
    %c2 = arith.constant 2 : index
    %c0_4 = arith.constant 0 : index
    %c0_5 = arith.constant 0 : index
    %4 = vector.load %arg2[%c2, %c0_4, %c0_5] : memref<4x32x32xf32, #tpu.memory_space<vmem>>, vector<1x32x32xf32>
    %5 = vector.shape_cast %4 : vector<1x32x32xf32> to vector<32x32xf32>
    %c3 = arith.constant 3 : index
    %c0_6 = arith.constant 0 : index
    %c0_7 = arith.constant 0 : index
    %6 = vector.load %arg2[%c3, %c0_6, %c0_7] : memref<4x32x32xf32, #tpu.memory_space<vmem>>, vector<1x32x32xf32>
    %7 = vector.shape_cast %6 : vector<1x32x32xf32> to vector<32x32xf32>
    %cst = arith.constant 0.000000e+00 : f32
    %8 = vector.broadcast %cst : f32 to vector<2x32xf32>
    %cst_8 = arith.constant 0.000000e+00 : f32
    %9 = vector.broadcast %cst_8 : f32 to vector<2x32xf32>
    %c0_i32 = arith.constant 0 : i32
    %10 = arith.index_cast %c0_i32 : i32 to index
    %c0_9 = arith.constant 0 : index
    %c0_10 = arith.constant 0 : index
    %c0_11 = arith.constant 0 : index
    %11 = vector.load %arg1[%10, %c0_9, %c0_10, %c0_11] : memref<8x4x2x32xf32, #tpu.memory_space<vmem>>, vector<1x4x2x32xf32>
    %12 = vector.shape_cast %11 : vector<1x4x2x32xf32> to vector<4x2x32xf32>
    %13 = vector.extract_strided_slice %12 {offsets = [0, 0, 0], sizes = [1, 2, 32], strides = [1, 1, 1]} : vector<4x2x32xf32> to vector<1x2x32xf32>
    %14 = vector.shape_cast %13 : vector<1x2x32xf32> to vector<2x32xf32>
    %cst_12 = arith.constant dense<0.000000e+00> : vector<2x32xf32>
    %15 = tpu.matmul %8, %1, %cst_12 {dimension_numbers = #tpu.dot_dimension_numbers<[1], [0], [0], [1], [0, 0, 1, 1], [], []>} : vector<2x32xf32>, vector<32x32xf32>, vector<2x32xf32> -> vector<2x32xf32>
    %16 = arith.addf %14, %15 : vector<2x32xf32>
    %17 = arith.negf %16 : vector<2x32xf32>
    %18 = math.exp %17 : vector<2x32xf32>
    %cst_13 = arith.constant 1.000000e+00 : f32
    %19 = vector.broadcast %cst_13 : f32 to vector<2x32xf32>
    %20 = arith.addf %19, %18 : vector<2x32xf32>
    %21 = arith.divf %19, %20 : vector<2x32xf32>
    %22 = vector.extract_strided_slice %12 {offsets = [1, 0, 0], sizes = [1, 2, 32], strides = [1, 1, 1]} : vector<4x2x32xf32> to vector<1x2x32xf32>
    %23 = vector.shape_cast %22 : vector<1x2x32xf32> to vector<2x32xf32>
    %cst_14 = arith.constant dense<0.000000e+00> : vector<2x32xf32>
    %24 = tpu.matmul %8, %3, %cst_14 {dimension_numbers = #tpu.dot_dimension_numbers<[1], [0], [0], [1], [0, 0, 1, 1], [], []>} : vector<2x32xf32>, vector<32x32xf32>, vector<2x32xf32> -> vector<2x32xf32>
    %25 = arith.addf %23, %24 : vector<2x32xf32>
    %26 = arith.negf %25 : vector<2x32xf32>
    %27 = math.exp %26 : vector<2x32xf32>
    %cst_15 = arith.constant 1.000000e+00 : f32
    %28 = vector.broadcast %cst_15 : f32 to vector<2x32xf32>
    %29 = arith.addf %28, %27 : vector<2x32xf32>
    %30 = arith.divf %28, %29 : vector<2x32xf32>
    %31 = vector.extract_strided_slice %12 {offsets = [2, 0, 0], sizes = [1, 2, 32], strides = [1, 1, 1]} : vector<4x2x32xf32> to vector<1x2x32xf32>
    %32 = vector.shape_cast %31 : vector<1x2x32xf32> to vector<2x32xf32>
    %cst_16 = arith.constant dense<0.000000e+00> : vector<2x32xf32>
    %33 = tpu.matmul %8, %5, %cst_16 {dimension_numbers = #tpu.dot_dimension_numbers<[1], [0], [0], [1], [0, 0, 1, 1], [], []>} : vector<2x32xf32>, vector<32x32xf32>, vector<2x32xf32> -> vector<2x32xf32>
    %34 = arith.addf %32, %33 : vector<2x32xf32>
    %35 = math.tanh %34 : vector<2x32xf32>
    %36 = vector.extract_strided_slice %12 {offsets = [3, 0, 0], sizes = [1, 2, 32], strides = [1, 1, 1]} : vector<4x2x32xf32> to vector<1x2x32xf32>
    %37 = vector.shape_cast %36 : vector<1x2x32xf32> to vector<2x32xf32>
    %cst_17 = arith.constant dense<0.000000e+00> : vector<2x32xf32>
    %38 = tpu.matmul %8, %7, %cst_17 {dimension_numbers = #tpu.dot_dimension_numbers<[1], [0], [0], [1], [0, 0, 1, 1], [], []>} : vector<2x32xf32>, vector<32x32xf32>, vector<2x32xf32> -> vector<2x32xf32>
    %39 = arith.addf %37, %38 : vector<2x32xf32>
    %40 = arith.negf %39 : vector<2x32xf32>
    %41 = math.exp %40 : vector<2x32xf32>
    %cst_18 = arith.constant 1.000000e+00 : f32
    %42 = vector.broadcast %cst_18 : f32 to vector<2x32xf32>
    %43 = arith.addf %42, %41 : vector<2x32xf32>
    %44 = arith.divf %42, %43 : vector<2x32xf32>
    %45 = arith.mulf %30, %9 : vector<2x32xf32>
    %46 = arith.mulf %21, %35 : vector<2x32xf32>
    %47 = arith.addf %45, %46 : vector<2x32xf32>
    %48 = math.tanh %47 : vector<2x32xf32>
    %49 = arith.mulf %44, %48 : vector<2x32xf32>
    %50 = arith.index_cast %c0_i32 : i32 to index
    %c0_19 = arith.constant 0 : index
    %c0_20 = arith.constant 0 : index
    %51 = vector.load %arg3[%50, %c0_19, %c0_20] : memref<8x2x32xf32, #tpu.memory_space<vmem>>, vector<1x2x32xf32>
    %52 = vector.shape_cast %51 : vector<1x2x32xf32> to vector<2x32xf32>
    %53 = vector.shape_cast %49 : vector<2x32xf32> to vector<1x2x32xf32>
    tpu.vector_store %arg3[%50, %c0_19, %c0_20], %53 {strides = array<i32>} : memref<8x2x32xf32, #tpu.memory_space<vmem>>, vector<1x2x32xf32>,
    %c1_i32 = arith.constant 1 : i32
    %54 = arith.index_cast %c1_i32 : i32 to index
    %c0_21 = arith.constant 0 : index
    %c0_22 = arith.constant 0 : index
    %c0_23 = arith.constant 0 : index
    %55 = vector.load %arg1[%54, %c0_21, %c0_22, %c0_23] : memref<8x4x2x32xf32, #tpu.memory_space<vmem>>, vector<1x4x2x32xf32>
    %56 = vector.shape_cast %55 : vector<1x4x2x32xf32> to vector<4x2x32xf32>
    %57 = vector.extract_strided_slice %56 {offsets = [0, 0, 0], sizes = [1, 2, 32], strides = [1, 1, 1]} : vector<4x2x32xf32> to vector<1x2x32xf32>
    %58 = vector.shape_cast %57 : vector<1x2x32xf32> to vector<2x32xf32>
    %cst_24 = arith.constant dense<0.000000e+00> : vector<2x32xf32>
    %59 = tpu.matmul %49, %1, %cst_24 {dimension_numbers = #tpu.dot_dimension_numbers<[1], [0], [0], [1], [0, 0, 1, 1], [], []>} : vector<2x32xf32>, vector<32x32xf32>, vector<2x32xf32> -> vector<2x32xf32>
    %60 = arith.addf %58, %59 : vector<2x32xf32>
    %61 = arith.negf %60 : vector<2x32xf32>
    %62 = math.exp %61 : vector<2x32xf32>
    %cst_25 = arith.constant 1.000000e+00 : f32
    %63 = vector.broadcast %cst_25 : f32 to vector<2x32xf32>
    %64 = arith.addf %63, %62 : vector<2x32xf32>
    %65 = arith.divf %63, %64 : vector<2x32xf32>
    %66 = vector.extract_strided_slice %56 {offsets = [1, 0, 0], sizes = [1, 2, 32], strides = [1, 1, 1]} : vector<4x2x32xf32> to vector<1x2x32xf32>
    %67 = vector.shape_cast %66 : vector<1x2x32xf32> to vector<2x32xf32>
    %cst_26 = arith.constant dense<0.000000e+00> : vector<2x32xf32>
    %68 = tpu.matmul %49, %3, %cst_26 {dimension_numbers = #tpu.dot_dimension_numbers<[1], [0], [0], [1], [0, 0, 1, 1], [], []>} : vector<2x32xf32>, vector<32x32xf32>, vector<2x32xf32> -> vector<2x32xf32>
    %69 = arith.addf %67, %68 : vector<2x32xf32>
    %70 = arith.negf %69 : vector<2x32xf32>
    %71 = math.exp %70 : vector<2x32xf32>
    %cst_27 = arith.constant 1.000000e+00 : f32
    %72 = vector.broadcast %cst_27 : f32 to vector<2x32xf32>
    %73 = arith.addf %72, %71 : vector<2x32xf32>
    %74 = arith.divf %72, %73 : vector<2x32xf32>
    %75 = vector.extract_strided_slice %56 {offsets = [2, 0, 0], sizes = [1, 2, 32], strides = [1, 1, 1]} : vector<4x2x32xf32> to vector<1x2x32xf32>
    %76 = vector.shape_cast %75 : vector<1x2x32xf32> to vector<2x32xf32>
    %cst_28 = arith.constant dense<0.000000e+00> : vector<2x32xf32>
    %77 = tpu.matmul %49, %5, %cst_28 {dimension_numbers = #tpu.dot_dimension_numbers<[1], [0], [0], [1], [0, 0, 1, 1], [], []>} : vector<2x32xf32>, vector<32x32xf32>, vector<2x32xf32> -> vector<2x32xf32>
    %78 = arith.addf %76, %77 : vector<2x32xf32>
    %79 = math.tanh %78 : vector<2x32xf32>
    %80 = vector.extract_strided_slice %56 {offsets = [3, 0, 0], sizes = [1, 2, 32], strides = [1, 1, 1]} : vector<4x2x32xf32> to vector<1x2x32xf32>
    %81 = vector.shape_cast %80 : vector<1x2x32xf32> to vector<2x32xf32>
    %cst_29 = arith.constant dense<0.000000e+00> : vector<2x32xf32>
    %82 = tpu.matmul %49, %7, %cst_29 {dimension_numbers = #tpu.dot_dimension_numbers<[1], [0], [0], [1], [0, 0, 1, 1], [], []>} : vector<2x32xf32>, vector<32x32xf32>, vector<2x32xf32> -> vector<2x32xf32>
    %83 = arith.addf %81, %82 : vector<2x32xf32>
    %84 = arith.negf %83 : vector<2x32xf32>
    %85 = math.exp %84 : vector<2x32xf32>
    %cst_30 = arith.constant 1.000000e+00 : f32
    %86 = vector.broadcast %cst_30 : f32 to vector<2x32xf32>
    %87 = arith.addf %86, %85 : vector<2x32xf32>
    %88 = arith.divf %86, %87 : vector<2x32xf32>
    %89 = arith.mulf %74, %47 : vector<2x32xf32>
    %90 = arith.mulf %65, %79 : vector<2x32xf32>
    %91 = arith.addf %89, %90 : vector<2x32xf32>
    %92 = math.tanh %91 : vector<2x32xf32>
    %93 = arith.mulf %88, %92 : vector<2x32xf32>
    %94 = arith.index_cast %c1_i32 : i32 to index
    %c0_31 = arith.constant 0 : index
    %c0_32 = arith.constant 0 : index
    %95 = vector.load %arg3[%94, %c0_31, %c0_32] : memref<8x2x32xf32, #tpu.memory_space<vmem>>, vector<1x2x32xf32>
    %96 = vector.shape_cast %95 : vector<1x2x32xf32> to vector<2x32xf32>
    %97 = vector.shape_cast %93 : vector<2x32xf32> to vector<1x2x32xf32>
    tpu.vector_store %arg3[%94, %c0_31, %c0_32], %97 {strides = array<i32>} : memref<8x2x32xf32, #tpu.memory_space<vmem>>, vector<1x2x32xf32>,
    %c2_i32 = arith.constant 2 : i32
    %98 = arith.index_cast %c2_i32 : i32 to index
    %c0_33 = arith.constant 0 : index
    %c0_34 = arith.constant 0 : index
    %c0_35 = arith.constant 0 : index
    %99 = vector.load %arg1[%98, %c0_33, %c0_34, %c0_35] : memref<8x4x2x32xf32, #tpu.memory_space<vmem>>, vector<1x4x2x32xf32>
    %100 = vector.shape_cast %99 : vector<1x4x2x32xf32> to vector<4x2x32xf32>
    %101 = vector.extract_strided_slice %100 {offsets = [0, 0, 0], sizes = [1, 2, 32], strides = [1, 1, 1]} : vector<4x2x32xf32> to vector<1x2x32xf32>
    %102 = vector.shape_cast %101 : vector<1x2x32xf32> to vector<2x32xf32>
    %cst_36 = arith.constant dense<0.000000e+00> : vector<2x32xf32>
    %103 = tpu.matmul %93, %1, %cst_36 {dimension_numbers = #tpu.dot_dimension_numbers<[1], [0], [0], [1], [0, 0, 1, 1], [], []>} : vector<2x32xf32>, vector<32x32xf32>, vector<2x32xf32> -> vector<2x32xf32>
    %104 = arith.addf %102, %103 : vector<2x32xf32>
    %105 = arith.negf %104 : vector<2x32xf32>
    %106 = math.exp %105 : vector<2x32xf32>
    %cst_37 = arith.constant 1.000000e+00 : f32
    %107 = vector.broadcast %cst_37 : f32 to vector<2x32xf32>
    %108 = arith.addf %107, %106 : vector<2x32xf32>
    %109 = arith.divf %107, %108 : vector<2x32xf32>
    %110 = vector.extract_strided_slice %100 {offsets = [1, 0, 0], sizes = [1, 2, 32], strides = [1, 1, 1]} : vector<4x2x32xf32> to vector<1x2x32xf32>
    %111 = vector.shape_cast %110 : vector<1x2x32xf32> to vector<2x32xf32>
    %cst_38 = arith.constant dense<0.000000e+00> : vector<2x32xf32>
    %112 = tpu.matmul %93, %3, %cst_38 {dimension_numbers = #tpu.dot_dimension_numbers<[1], [0], [0], [1], [0, 0, 1, 1], [], []>} : vector<2x32xf32>, vector<32x32xf32>, vector<2x32xf32> -> vector<2x32xf32>
    %113 = arith.addf %111, %112 : vector<2x32xf32>
    %114 = arith.negf %113 : vector<2x32xf32>
    %115 = math.exp %114 : vector<2x32xf32>
    %cst_39 = arith.constant 1.000000e+00 : f32
    %116 = vector.broadcast %cst_39 : f32 to vector<2x32xf32>
    %117 = arith.addf %116, %115 : vector<2x32xf32>
    %118 = arith.divf %116, %117 : vector<2x32xf32>
    %119 = vector.extract_strided_slice %100 {offsets = [2, 0, 0], sizes = [1, 2, 32], strides = [1, 1, 1]} : vector<4x2x32xf32> to vector<1x2x32xf32>
    %120 = vector.shape_cast %119 : vector<1x2x32xf32> to vector<2x32xf32>
    %cst_40 = arith.constant dense<0.000000e+00> : vector<2x32xf32>
    %121 = tpu.matmul %93, %5, %cst_40 {dimension_numbers = #tpu.dot_dimension_numbers<[1], [0], [0], [1], [0, 0, 1, 1], [], []>} : vector<2x32xf32>, vector<32x32xf32>, vector<2x32xf32> -> vector<2x32xf32>
    %122 = arith.addf %120, %121 : vector<2x32xf32>
    %123 = math.tanh %122 : vector<2x32xf32>
    %124 = vector.extract_strided_slice %100 {offsets = [3, 0, 0], sizes = [1, 2, 32], strides = [1, 1, 1]} : vector<4x2x32xf32> to vector<1x2x32xf32>
    %125 = vector.shape_cast %124 : vector<1x2x32xf32> to vector<2x32xf32>
    %cst_41 = arith.constant dense<0.000000e+00> : vector<2x32xf32>
    %126 = tpu.matmul %93, %7, %cst_41 {dimension_numbers = #tpu.dot_dimension_numbers<[1], [0], [0], [1], [0, 0, 1, 1], [], []>} : vector<2x32xf32>, vector<32x32xf32>, vector<2x32xf32> -> vector<2x32xf32>
    %127 = arith.addf %125, %126 : vector<2x32xf32>
    %128 = arith.negf %127 : vector<2x32xf32>
    %129 = math.exp %128 : vector<2x32xf32>
    %cst_42 = arith.constant 1.000000e+00 : f32
    %130 = vector.broadcast %cst_42 : f32 to vector<2x32xf32>
    %131 = arith.addf %130, %129 : vector<2x32xf32>
    %132 = arith.divf %130, %131 : vector<2x32xf32>
    %133 = arith.mulf %118, %91 : vector<2x32xf32>
    %134 = arith.mulf %109, %123 : vector<2x32xf32>
    %135 = arith.addf %133, %134 : vector<2x32xf32>
    %136 = math.tanh %135 : vector<2x32xf32>
    %137 = arith.mulf %132, %136 : vector<2x32xf32>
    %138 = arith.index_cast %c2_i32 : i32 to index
    %c0_43 = arith.constant 0 : index
    %c0_44 = arith.constant 0 : index
    %139 = vector.load %arg3[%138, %c0_43, %c0_44] : memref<8x2x32xf32, #tpu.memory_space<vmem>>, vector<1x2x32xf32>
    %140 = vector.shape_cast %139 : vector<1x2x32xf32> to vector<2x32xf32>
    %141 = vector.shape_cast %137 : vector<2x32xf32> to vector<1x2x32xf32>
    tpu.vector_store %arg3[%138, %c0_43, %c0_44], %141 {strides = array<i32>} : memref<8x2x32xf32, #tpu.memory_space<vmem>>, vector<1x2x32xf32>,
    %c3_i32 = arith.constant 3 : i32
    %142 = arith.index_cast %c3_i32 : i32 to index
    %c0_45 = arith.constant 0 : index
    %c0_46 = arith.constant 0 : index
    %c0_47 = arith.constant 0 : index
    %143 = vector.load %arg1[%142, %c0_45, %c0_46, %c0_47] : memref<8x4x2x32xf32, #tpu.memory_space<vmem>>, vector<1x4x2x32xf32>
    %144 = vector.shape_cast %143 : vector<1x4x2x32xf32> to vector<4x2x32xf32>
    %145 = vector.extract_strided_slice %144 {offsets = [0, 0, 0], sizes = [1, 2, 32], strides = [1, 1, 1]} : vector<4x2x32xf32> to vector<1x2x32xf32>
    %146 = vector.shape_cast %145 : vector<1x2x32xf32> to vector<2x32xf32>
    %cst_48 = arith.constant dense<0.000000e+00> : vector<2x32xf32>
    %147 = tpu.matmul %137, %1, %cst_48 {dimension_numbers = #tpu.dot_dimension_numbers<[1], [0], [0], [1], [0, 0, 1, 1], [], []>} : vector<2x32xf32>, vector<32x32xf32>, vector<2x32xf32> -> vector<2x32xf32>
    %148 = arith.addf %146, %147 : vector<2x32xf32>
    %149 = arith.negf %148 : vector<2x32xf32>
    %150 = math.exp %149 : vector<2x32xf32>
    %cst_49 = arith.constant 1.000000e+00 : f32
    %151 = vector.broadcast %cst_49 : f32 to vector<2x32xf32>
    %152 = arith.addf %151, %150 : vector<2x32xf32>
    %153 = arith.divf %151, %152 : vector<2x32xf32>
    %154 = vector.extract_strided_slice %144 {offsets = [1, 0, 0], sizes = [1, 2, 32], strides = [1, 1, 1]} : vector<4x2x32xf32> to vector<1x2x32xf32>
    %155 = vector.shape_cast %154 : vector<1x2x32xf32> to vector<2x32xf32>
    %cst_50 = arith.constant dense<0.000000e+00> : vector<2x32xf32>
    %156 = tpu.matmul %137, %3, %cst_50 {dimension_numbers = #tpu.dot_dimension_numbers<[1], [0], [0], [1], [0, 0, 1, 1], [], []>} : vector<2x32xf32>, vector<32x32xf32>, vector<2x32xf32> -> vector<2x32xf32>
    %157 = arith.addf %155, %156 : vector<2x32xf32>
    %158 = arith.negf %157 : vector<2x32xf32>
    %159 = math.exp %158 : vector<2x32xf32>
    %cst_51 = arith.constant 1.000000e+00 : f32
    %160 = vector.broadcast %cst_51 : f32 to vector<2x32xf32>
    %161 = arith.addf %160, %159 : vector<2x32xf32>
    %162 = arith.divf %160, %161 : vector<2x32xf32>
    %163 = vector.extract_strided_slice %144 {offsets = [2, 0, 0], sizes = [1, 2, 32], strides = [1, 1, 1]} : vector<4x2x32xf32> to vector<1x2x32xf32>
    %164 = vector.shape_cast %163 : vector<1x2x32xf32> to vector<2x32xf32>
    %cst_52 = arith.constant dense<0.000000e+00> : vector<2x32xf32>
    %165 = tpu.matmul %137, %5, %cst_52 {dimension_numbers = #tpu.dot_dimension_numbers<[1], [0], [0], [1], [0, 0, 1, 1], [], []>} : vector<2x32xf32>, vector<32x32xf32>, vector<2x32xf32> -> vector<2x32xf32>
    %166 = arith.addf %164, %165 : vector<2x32xf32>
    %167 = math.tanh %166 : vector<2x32xf32>
    %168 = vector.extract_strided_slice %144 {offsets = [3, 0, 0], sizes = [1, 2, 32], strides = [1, 1, 1]} : vector<4x2x32xf32> to vector<1x2x32xf32>
    %169 = vector.shape_cast %168 : vector<1x2x32xf32> to vector<2x32xf32>
    %cst_53 = arith.constant dense<0.000000e+00> : vector<2x32xf32>
    %170 = tpu.matmul %137, %7, %cst_53 {dimension_numbers = #tpu.dot_dimension_numbers<[1], [0], [0], [1], [0, 0, 1, 1], [], []>} : vector<2x32xf32>, vector<32x32xf32>, vector<2x32xf32> -> vector<2x32xf32>
    %171 = arith.addf %169, %170 : vector<2x32xf32>
    %172 = arith.negf %171 : vector<2x32xf32>
    %173 = math.exp %172 : vector<2x32xf32>
    %cst_54 = arith.constant 1.000000e+00 : f32
    %174 = vector.broadcast %cst_54 : f32 to vector<2x32xf32>
    %175 = arith.addf %174, %173 : vector<2x32xf32>
    %176 = arith.divf %174, %175 : vector<2x32xf32>
    %177 = arith.mulf %162, %135 : vector<2x32xf32>
    %178 = arith.mulf %153, %167 : vector<2x32xf32>
    %179 = arith.addf %177, %178 : vector<2x32xf32>
    %180 = math.tanh %179 : vector<2x32xf32>
    %181 = arith.mulf %176, %180 : vector<2x32xf32>
    %182 = arith.index_cast %c3_i32 : i32 to index
    %c0_55 = arith.constant 0 : index
    %c0_56 = arith.constant 0 : index
    %183 = vector.load %arg3[%182, %c0_55, %c0_56] : memref<8x2x32xf32, #tpu.memory_space<vmem>>, vector<1x2x32xf32>
    %184 = vector.shape_cast %183 : vector<1x2x32xf32> to vector<2x32xf32>
    %185 = vector.shape_cast %181 : vector<2x32xf32> to vector<1x2x32xf32>
    tpu.vector_store %arg3[%182, %c0_55, %c0_56], %185 {strides = array<i32>} : memref<8x2x32xf32, #tpu.memory_space<vmem>>, vector<1x2x32xf32>,
    %c4_i32 = arith.constant 4 : i32
    %186 = arith.index_cast %c4_i32 : i32 to index
    %c0_57 = arith.constant 0 : index
    %c0_58 = arith.constant 0 : index
    %c0_59 = arith.constant 0 : index
    %187 = vector.load %arg1[%186, %c0_57, %c0_58, %c0_59] : memref<8x4x2x32xf32, #tpu.memory_space<vmem>>, vector<1x4x2x32xf32>
    %188 = vector.shape_cast %187 : vector<1x4x2x32xf32> to vector<4x2x32xf32>
    %189 = vector.extract_strided_slice %188 {offsets = [0, 0, 0], sizes = [1, 2, 32], strides = [1, 1, 1]} : vector<4x2x32xf32> to vector<1x2x32xf32>
    %190 = vector.shape_cast %189 : vector<1x2x32xf32> to vector<2x32xf32>
    %cst_60 = arith.constant dense<0.000000e+00> : vector<2x32xf32>
    %191 = tpu.matmul %181, %1, %cst_60 {dimension_numbers = #tpu.dot_dimension_numbers<[1], [0], [0], [1], [0, 0, 1, 1], [], []>} : vector<2x32xf32>, vector<32x32xf32>, vector<2x32xf32> -> vector<2x32xf32>
    %192 = arith.addf %190, %191 : vector<2x32xf32>
    %193 = arith.negf %192 : vector<2x32xf32>
    %194 = math.exp %193 : vector<2x32xf32>
    %cst_61 = arith.constant 1.000000e+00 : f32
    %195 = vector.broadcast %cst_61 : f32 to vector<2x32xf32>
    %196 = arith.addf %195, %194 : vector<2x32xf32>
    %197 = arith.divf %195, %196 : vector<2x32xf32>
    %198 = vector.extract_strided_slice %188 {offsets = [1, 0, 0], sizes = [1, 2, 32], strides = [1, 1, 1]} : vector<4x2x32xf32> to vector<1x2x32xf32>
    %199 = vector.shape_cast %198 : vector<1x2x32xf32> to vector<2x32xf32>
    %cst_62 = arith.constant dense<0.000000e+00> : vector<2x32xf32>
    %200 = tpu.matmul %181, %3, %cst_62 {dimension_numbers = #tpu.dot_dimension_numbers<[1], [0], [0], [1], [0, 0, 1, 1], [], []>} : vector<2x32xf32>, vector<32x32xf32>, vector<2x32xf32> -> vector<2x32xf32>
    %201 = arith.addf %199, %200 : vector<2x32xf32>
    %202 = arith.negf %201 : vector<2x32xf32>
    %203 = math.exp %202 : vector<2x32xf32>
    %cst_63 = arith.constant 1.000000e+00 : f32
    %204 = vector.broadcast %cst_63 : f32 to vector<2x32xf32>
    %205 = arith.addf %204, %203 : vector<2x32xf32>
    %206 = arith.divf %204, %205 : vector<2x32xf32>
    %207 = vector.extract_strided_slice %188 {offsets = [2, 0, 0], sizes = [1, 2, 32], strides = [1, 1, 1]} : vector<4x2x32xf32> to vector<1x2x32xf32>
    %208 = vector.shape_cast %207 : vector<1x2x32xf32> to vector<2x32xf32>
    %cst_64 = arith.constant dense<0.000000e+00> : vector<2x32xf32>
    %209 = tpu.matmul %181, %5, %cst_64 {dimension_numbers = #tpu.dot_dimension_numbers<[1], [0], [0], [1], [0, 0, 1, 1], [], []>} : vector<2x32xf32>, vector<32x32xf32>, vector<2x32xf32> -> vector<2x32xf32>
    %210 = arith.addf %208, %209 : vector<2x32xf32>
    %211 = math.tanh %210 : vector<2x32xf32>
    %212 = vector.extract_strided_slice %188 {offsets = [3, 0, 0], sizes = [1, 2, 32], strides = [1, 1, 1]} : vector<4x2x32xf32> to vector<1x2x32xf32>
    %213 = vector.shape_cast %212 : vector<1x2x32xf32> to vector<2x32xf32>
    %cst_65 = arith.constant dense<0.000000e+00> : vector<2x32xf32>
    %214 = tpu.matmul %181, %7, %cst_65 {dimension_numbers = #tpu.dot_dimension_numbers<[1], [0], [0], [1], [0, 0, 1, 1], [], []>} : vector<2x32xf32>, vector<32x32xf32>, vector<2x32xf32> -> vector<2x32xf32>
    %215 = arith.addf %213, %214 : vector<2x32xf32>
    %216 = arith.negf %215 : vector<2x32xf32>
    %217 = math.exp %216 : vector<2x32xf32>
    %cst_66 = arith.constant 1.000000e+00 : f32
    %218 = vector.broadcast %cst_66 : f32 to vector<2x32xf32>
    %219 = arith.addf %218, %217 : vector<2x32xf32>
    %220 = arith.divf %218, %219 : vector<2x32xf32>
    %221 = arith.mulf %206, %179 : vector<2x32xf32>
    %222 = arith.mulf %197, %211 : vector<2x32xf32>
    %223 = arith.addf %221, %222 : vector<2x32xf32>
    %224 = math.tanh %223 : vector<2x32xf32>
    %225 = arith.mulf %220, %224 : vector<2x32xf32>
    %226 = arith.index_cast %c4_i32 : i32 to index
    %c0_67 = arith.constant 0 : index
    %c0_68 = arith.constant 0 : index
    %227 = vector.load %arg3[%226, %c0_67, %c0_68] : memref<8x2x32xf32, #tpu.memory_space<vmem>>, vector<1x2x32xf32>
    %228 = vector.shape_cast %227 : vector<1x2x32xf32> to vector<2x32xf32>
    %229 = vector.shape_cast %225 : vector<2x32xf32> to vector<1x2x32xf32>
    tpu.vector_store %arg3[%226, %c0_67, %c0_68], %229 {strides = array<i32>} : memref<8x2x32xf32, #tpu.memory_space<vmem>>, vector<1x2x32xf32>,
    %c5_i32 = arith.constant 5 : i32
    %230 = arith.index_cast %c5_i32 : i32 to index
    %c0_69 = arith.constant 0 : index
    %c0_70 = arith.constant 0 : index
    %c0_71 = arith.constant 0 : index
    %231 = vector.load %arg1[%230, %c0_69, %c0_70, %c0_71] : memref<8x4x2x32xf32, #tpu.memory_space<vmem>>, vector<1x4x2x32xf32>
    %232 = vector.shape_cast %231 : vector<1x4x2x32xf32> to vector<4x2x32xf32>
    %233 = vector.extract_strided_slice %232 {offsets = [0, 0, 0], sizes = [1, 2, 32], strides = [1, 1, 1]} : vector<4x2x32xf32> to vector<1x2x32xf32>
    %234 = vector.shape_cast %233 : vector<1x2x32xf32> to vector<2x32xf32>
    %cst_72 = arith.constant dense<0.000000e+00> : vector<2x32xf32>
    %235 = tpu.matmul %225, %1, %cst_72 {dimension_numbers = #tpu.dot_dimension_numbers<[1], [0], [0], [1], [0, 0, 1, 1], [], []>} : vector<2x32xf32>, vector<32x32xf32>, vector<2x32xf32> -> vector<2x32xf32>
    %236 = arith.addf %234, %235 : vector<2x32xf32>
    %237 = arith.negf %236 : vector<2x32xf32>
    %238 = math.exp %237 : vector<2x32xf32>
    %cst_73 = arith.constant 1.000000e+00 : f32
    %239 = vector.broadcast %cst_73 : f32 to vector<2x32xf32>
    %240 = arith.addf %239, %238 : vector<2x32xf32>
    %241 = arith.divf %239, %240 : vector<2x32xf32>
    %242 = vector.extract_strided_slice %232 {offsets = [1, 0, 0], sizes = [1, 2, 32], strides = [1, 1, 1]} : vector<4x2x32xf32> to vector<1x2x32xf32>
    %243 = vector.shape_cast %242 : vector<1x2x32xf32> to vector<2x32xf32>
    %cst_74 = arith.constant dense<0.000000e+00> : vector<2x32xf32>
    %244 = tpu.matmul %225, %3, %cst_74 {dimension_numbers = #tpu.dot_dimension_numbers<[1], [0], [0], [1], [0, 0, 1, 1], [], []>} : vector<2x32xf32>, vector<32x32xf32>, vector<2x32xf32> -> vector<2x32xf32>
    %245 = arith.addf %243, %244 : vector<2x32xf32>
    %246 = arith.negf %245 : vector<2x32xf32>
    %247 = math.exp %246 : vector<2x32xf32>
    %cst_75 = arith.constant 1.000000e+00 : f32
    %248 = vector.broadcast %cst_75 : f32 to vector<2x32xf32>
    %249 = arith.addf %248, %247 : vector<2x32xf32>
    %250 = arith.divf %248, %249 : vector<2x32xf32>
    %251 = vector.extract_strided_slice %232 {offsets = [2, 0, 0], sizes = [1, 2, 32], strides = [1, 1, 1]} : vector<4x2x32xf32> to vector<1x2x32xf32>
    %252 = vector.shape_cast %251 : vector<1x2x32xf32> to vector<2x32xf32>
    %cst_76 = arith.constant dense<0.000000e+00> : vector<2x32xf32>
    %253 = tpu.matmul %225, %5, %cst_76 {dimension_numbers = #tpu.dot_dimension_numbers<[1], [0], [0], [1], [0, 0, 1, 1], [], []>} : vector<2x32xf32>, vector<32x32xf32>, vector<2x32xf32> -> vector<2x32xf32>
    %254 = arith.addf %252, %253 : vector<2x32xf32>
    %255 = math.tanh %254 : vector<2x32xf32>
    %256 = vector.extract_strided_slice %232 {offsets = [3, 0, 0], sizes = [1, 2, 32], strides = [1, 1, 1]} : vector<4x2x32xf32> to vector<1x2x32xf32>
    %257 = vector.shape_cast %256 : vector<1x2x32xf32> to vector<2x32xf32>
    %cst_77 = arith.constant dense<0.000000e+00> : vector<2x32xf32>
    %258 = tpu.matmul %225, %7, %cst_77 {dimension_numbers = #tpu.dot_dimension_numbers<[1], [0], [0], [1], [0, 0, 1, 1], [], []>} : vector<2x32xf32>, vector<32x32xf32>, vector<2x32xf32> -> vector<2x32xf32>
    %259 = arith.addf %257, %258 : vector<2x32xf32>
    %260 = arith.negf %259 : vector<2x32xf32>
    %261 = math.exp %260 : vector<2x32xf32>
    %cst_78 = arith.constant 1.000000e+00 : f32
    %262 = vector.broadcast %cst_78 : f32 to vector<2x32xf32>
    %263 = arith.addf %262, %261 : vector<2x32xf32>
    %264 = arith.divf %262, %263 : vector<2x32xf32>
    %265 = arith.mulf %250, %223 : vector<2x32xf32>
    %266 = arith.mulf %241, %255 : vector<2x32xf32>
    %267 = arith.addf %265, %266 : vector<2x32xf32>
    %268 = math.tanh %267 : vector<2x32xf32>
    %269 = arith.mulf %264, %268 : vector<2x32xf32>
    %270 = arith.index_cast %c5_i32 : i32 to index
    %c0_79 = arith.constant 0 : index
    %c0_80 = arith.constant 0 : index
    %271 = vector.load %arg3[%270, %c0_79, %c0_80] : memref<8x2x32xf32, #tpu.memory_space<vmem>>, vector<1x2x32xf32>
    %272 = vector.shape_cast %271 : vector<1x2x32xf32> to vector<2x32xf32>
    %273 = vector.shape_cast %269 : vector<2x32xf32> to vector<1x2x32xf32>
    tpu.vector_store %arg3[%270, %c0_79, %c0_80], %273 {strides = array<i32>} : memref<8x2x32xf32, #tpu.memory_space<vmem>>, vector<1x2x32xf32>,
    %c6_i32 = arith.constant 6 : i32
    %274 = arith.index_cast %c6_i32 : i32 to index
    %c0_81 = arith.constant 0 : index
    %c0_82 = arith.constant 0 : index
    %c0_83 = arith.constant 0 : index
    %275 = vector.load %arg1[%274, %c0_81, %c0_82, %c0_83] : memref<8x4x2x32xf32, #tpu.memory_space<vmem>>, vector<1x4x2x32xf32>
    %276 = vector.shape_cast %275 : vector<1x4x2x32xf32> to vector<4x2x32xf32>
    %277 = vector.extract_strided_slice %276 {offsets = [0, 0, 0], sizes = [1, 2, 32], strides = [1, 1, 1]} : vector<4x2x32xf32> to vector<1x2x32xf32>
    %278 = vector.shape_cast %277 : vector<1x2x32xf32> to vector<2x32xf32>
    %cst_84 = arith.constant dense<0.000000e+00> : vector<2x32xf32>
    %279 = tpu.matmul %269, %1, %cst_84 {dimension_numbers = #tpu.dot_dimension_numbers<[1], [0], [0], [1], [0, 0, 1, 1], [], []>} : vector<2x32xf32>, vector<32x32xf32>, vector<2x32xf32> -> vector<2x32xf32>
    %280 = arith.addf %278, %279 : vector<2x32xf32>
    %281 = arith.negf %280 : vector<2x32xf32>
    %282 = math.exp %281 : vector<2x32xf32>
    %cst_85 = arith.constant 1.000000e+00 : f32
    %283 = vector.broadcast %cst_85 : f32 to vector<2x32xf32>
    %284 = arith.addf %283, %282 : vector<2x32xf32>
    %285 = arith.divf %283, %284 : vector<2x32xf32>
    %286 = vector.extract_strided_slice %276 {offsets = [1, 0, 0], sizes = [1, 2, 32], strides = [1, 1, 1]} : vector<4x2x32xf32> to vector<1x2x32xf32>
    %287 = vector.shape_cast %286 : vector<1x2x32xf32> to vector<2x32xf32>
    %cst_86 = arith.constant dense<0.000000e+00> : vector<2x32xf32>
    %288 = tpu.matmul %269, %3, %cst_86 {dimension_numbers = #tpu.dot_dimension_numbers<[1], [0], [0], [1], [0, 0, 1, 1], [], []>} : vector<2x32xf32>, vector<32x32xf32>, vector<2x32xf32> -> vector<2x32xf32>
    %289 = arith.addf %287, %288 : vector<2x32xf32>
    %290 = arith.negf %289 : vector<2x32xf32>
    %291 = math.exp %290 : vector<2x32xf32>
    %cst_87 = arith.constant 1.000000e+00 : f32
    %292 = vector.broadcast %cst_87 : f32 to vector<2x32xf32>
    %293 = arith.addf %292, %291 : vector<2x32xf32>
    %294 = arith.divf %292, %293 : vector<2x32xf32>
    %295 = vector.extract_strided_slice %276 {offsets = [2, 0, 0], sizes = [1, 2, 32], strides = [1, 1, 1]} : vector<4x2x32xf32> to vector<1x2x32xf32>
    %296 = vector.shape_cast %295 : vector<1x2x32xf32> to vector<2x32xf32>
    %cst_88 = arith.constant dense<0.000000e+00> : vector<2x32xf32>
    %297 = tpu.matmul %269, %5, %cst_88 {dimension_numbers = #tpu.dot_dimension_numbers<[1], [0], [0], [1], [0, 0, 1, 1], [], []>} : vector<2x32xf32>, vector<32x32xf32>, vector<2x32xf32> -> vector<2x32xf32>
    %298 = arith.addf %296, %297 : vector<2x32xf32>
    %299 = math.tanh %298 : vector<2x32xf32>
    %300 = vector.extract_strided_slice %276 {offsets = [3, 0, 0], sizes = [1, 2, 32], strides = [1, 1, 1]} : vector<4x2x32xf32> to vector<1x2x32xf32>
    %301 = vector.shape_cast %300 : vector<1x2x32xf32> to vector<2x32xf32>
    %cst_89 = arith.constant dense<0.000000e+00> : vector<2x32xf32>
    %302 = tpu.matmul %269, %7, %cst_89 {dimension_numbers = #tpu.dot_dimension_numbers<[1], [0], [0], [1], [0, 0, 1, 1], [], []>} : vector<2x32xf32>, vector<32x32xf32>, vector<2x32xf32> -> vector<2x32xf32>
    %303 = arith.addf %301, %302 : vector<2x32xf32>
    %304 = arith.negf %303 : vector<2x32xf32>
    %305 = math.exp %304 : vector<2x32xf32>
    %cst_90 = arith.constant 1.000000e+00 : f32
    %306 = vector.broadcast %cst_90 : f32 to vector<2x32xf32>
    %307 = arith.addf %306, %305 : vector<2x32xf32>
    %308 = arith.divf %306, %307 : vector<2x32xf32>
    %309 = arith.mulf %294, %267 : vector<2x32xf32>
    %310 = arith.mulf %285, %299 : vector<2x32xf32>
    %311 = arith.addf %309, %310 : vector<2x32xf32>
    %312 = math.tanh %311 : vector<2x32xf32>
    %313 = arith.mulf %308, %312 : vector<2x32xf32>
    %314 = arith.index_cast %c6_i32 : i32 to index
    %c0_91 = arith.constant 0 : index
    %c0_92 = arith.constant 0 : index
    %315 = vector.load %arg3[%314, %c0_91, %c0_92] : memref<8x2x32xf32, #tpu.memory_space<vmem>>, vector<1x2x32xf32>
    %316 = vector.shape_cast %315 : vector<1x2x32xf32> to vector<2x32xf32>
    %317 = vector.shape_cast %313 : vector<2x32xf32> to vector<1x2x32xf32>
    tpu.vector_store %arg3[%314, %c0_91, %c0_92], %317 {strides = array<i32>} : memref<8x2x32xf32, #tpu.memory_space<vmem>>, vector<1x2x32xf32>,
    %c7_i32 = arith.constant 7 : i32
    %318 = arith.index_cast %c7_i32 : i32 to index
    %c0_93 = arith.constant 0 : index
    %c0_94 = arith.constant 0 : index
    %c0_95 = arith.constant 0 : index
    %319 = vector.load %arg1[%318, %c0_93, %c0_94, %c0_95] : memref<8x4x2x32xf32, #tpu.memory_space<vmem>>, vector<1x4x2x32xf32>
    %320 = vector.shape_cast %319 : vector<1x4x2x32xf32> to vector<4x2x32xf32>
    %321 = vector.extract_strided_slice %320 {offsets = [0, 0, 0], sizes = [1, 2, 32], strides = [1, 1, 1]} : vector<4x2x32xf32> to vector<1x2x32xf32>
    %322 = vector.shape_cast %321 : vector<1x2x32xf32> to vector<2x32xf32>
    %cst_96 = arith.constant dense<0.000000e+00> : vector<2x32xf32>
    %323 = tpu.matmul %313, %1, %cst_96 {dimension_numbers = #tpu.dot_dimension_numbers<[1], [0], [0], [1], [0, 0, 1, 1], [], []>} : vector<2x32xf32>, vector<32x32xf32>, vector<2x32xf32> -> vector<2x32xf32>
    %324 = arith.addf %322, %323 : vector<2x32xf32>
    %325 = arith.negf %324 : vector<2x32xf32>
    %326 = math.exp %325 : vector<2x32xf32>
    %cst_97 = arith.constant 1.000000e+00 : f32
    %327 = vector.broadcast %cst_97 : f32 to vector<2x32xf32>
    %328 = arith.addf %327, %326 : vector<2x32xf32>
    %329 = arith.divf %327, %328 : vector<2x32xf32>
    %330 = vector.extract_strided_slice %320 {offsets = [1, 0, 0], sizes = [1, 2, 32], strides = [1, 1, 1]} : vector<4x2x32xf32> to vector<1x2x32xf32>
    %331 = vector.shape_cast %330 : vector<1x2x32xf32> to vector<2x32xf32>
    %cst_98 = arith.constant dense<0.000000e+00> : vector<2x32xf32>
    %332 = tpu.matmul %313, %3, %cst_98 {dimension_numbers = #tpu.dot_dimension_numbers<[1], [0], [0], [1], [0, 0, 1, 1], [], []>} : vector<2x32xf32>, vector<32x32xf32>, vector<2x32xf32> -> vector<2x32xf32>
    %333 = arith.addf %331, %332 : vector<2x32xf32>
    %334 = arith.negf %333 : vector<2x32xf32>
    %335 = math.exp %334 : vector<2x32xf32>
    %cst_99 = arith.constant 1.000000e+00 : f32
    %336 = vector.broadcast %cst_99 : f32 to vector<2x32xf32>
    %337 = arith.addf %336, %335 : vector<2x32xf32>
    %338 = arith.divf %336, %337 : vector<2x32xf32>
    %339 = vector.extract_strided_slice %320 {offsets = [2, 0, 0], sizes = [1, 2, 32], strides = [1, 1, 1]} : vector<4x2x32xf32> to vector<1x2x32xf32>
    %340 = vector.shape_cast %339 : vector<1x2x32xf32> to vector<2x32xf32>
    %cst_100 = arith.constant dense<0.000000e+00> : vector<2x32xf32>
    %341 = tpu.matmul %313, %5, %cst_100 {dimension_numbers = #tpu.dot_dimension_numbers<[1], [0], [0], [1], [0, 0, 1, 1], [], []>} : vector<2x32xf32>, vector<32x32xf32>, vector<2x32xf32> -> vector<2x32xf32>
    %342 = arith.addf %340, %341 : vector<2x32xf32>
    %343 = math.tanh %342 : vector<2x32xf32>
    %344 = vector.extract_strided_slice %320 {offsets = [3, 0, 0], sizes = [1, 2, 32], strides = [1, 1, 1]} : vector<4x2x32xf32> to vector<1x2x32xf32>
    %345 = vector.shape_cast %344 : vector<1x2x32xf32> to vector<2x32xf32>
    %cst_101 = arith.constant dense<0.000000e+00> : vector<2x32xf32>
    %346 = tpu.matmul %313, %7, %cst_101 {dimension_numbers = #tpu.dot_dimension_numbers<[1], [0], [0], [1], [0, 0, 1, 1], [], []>} : vector<2x32xf32>, vector<32x32xf32>, vector<2x32xf32> -> vector<2x32xf32>
    %347 = arith.addf %345, %346 : vector<2x32xf32>
    %348 = arith.negf %347 : vector<2x32xf32>
    %349 = math.exp %348 : vector<2x32xf32>
    %cst_102 = arith.constant 1.000000e+00 : f32
    %350 = vector.broadcast %cst_102 : f32 to vector<2x32xf32>
    %351 = arith.addf %350, %349 : vector<2x32xf32>
    %352 = arith.divf %350, %351 : vector<2x32xf32>
    %353 = arith.mulf %338, %311 : vector<2x32xf32>
    %354 = arith.mulf %329, %343 : vector<2x32xf32>
    %355 = arith.addf %353, %354 : vector<2x32xf32>
    %356 = math.tanh %355 : vector<2x32xf32>
    %357 = arith.mulf %352, %356 : vector<2x32xf32>
    %358 = arith.index_cast %c7_i32 : i32 to index
    %c0_103 = arith.constant 0 : index
    %c0_104 = arith.constant 0 : index
    %359 = vector.load %arg3[%358, %c0_103, %c0_104] : memref<8x2x32xf32, #tpu.memory_space<vmem>>, vector<1x2x32xf32>
    %360 = vector.shape_cast %359 : vector<1x2x32xf32> to vector<2x32xf32>
    %361 = vector.shape_cast %357 : vector<2x32xf32> to vector<1x2x32xf32>
    tpu.vector_store %arg3[%358, %c0_103, %c0_104], %361 {strides = array<i32>} : memref<8x2x32xf32, #tpu.memory_space<vmem>>, vector<1x2x32xf32>,
    %c8_i32 = arith.constant 8 : i32
    return
  }
  func.func @transform_0(%arg0: i32) -> (i32, i32, i32, i32) {
    %c0_i32 = arith.constant 0 : i32
    %c0_i32_0 = arith.constant 0 : i32
    %c0_i32_1 = arith.constant 0 : i32
    %c0_i32_2 = arith.constant 0 : i32
    %c0_i32_3 = arith.constant 0 : i32
    return %c0_i32, %c0_i32_0, %c0_i32_1, %c0_i32_2 : i32, i32, i32, i32
  }
  func.func @transform_1(%arg0: i32) -> (i32, i32, i32) {
    %c0_i32 = arith.constant 0 : i32
    %c0_i32_0 = arith.constant 0 : i32
    %c0_i32_1 = arith.constant 0 : i32
    %c0_i32_2 = arith.constant 0 : i32
    return %c0_i32, %c0_i32_0, %c0_i32_1 : i32, i32, i32
  }
  func.func @transform_2(%arg0: i32) -> (i32, i32, i32) {
    %c0_i32 = arith.constant 0 : i32
    %c0_i32_0 = arith.constant 0 : i32
    %c0_i32_1 = arith.constant 0 : i32
    %c0_i32_2 = arith.constant 0 : i32
    return %c0_i32, %c0_i32_0, %c0_i32_1 : i32, i32, i32
  }
}

</mosaic_0001>

<bundles_post_ra>
// kernel: tpu_custom_call.1
= control target key start
LH: loop header
LB: loop body
LE: loop exit
PB: predicated region body
PF: predicated region fallthrough
CT: control target
= control target key end

     0   :  { %7 = vsyncpa [#allocation3], 0  ;;  %s1867_s0 = inlined_call_operand.hbm [shape: f32[8,4,2,32], index: 0, kind: input, shape index: {}]   ;;  %s1868_s1 = inlined_call_operand.hbm [shape: f32[4,32,32], index: 1, kind: input, shape index: {}]   ;;  %s1869_s2 = inlined_call_operand.hbm [shape: f32[8,2,32], index: 2, kind: output, shape index: {}]  }
   0x1   :  { %8 = vsyncpa [#allocation6], 0 }
   0x2   :  { %9 = vsyncpa [#allocation4], 0  ;;  %s14_s11 = sshll.u32 %s1867_s0, 4  ;;  %s1621_s12 = smov [#allocation2]   ;;  %s15_s11 = int_to_ptr.hbm [resolvable:$true] %s14_s11 }
   0x3   :  { %s16_s13 = sshll.u32 %s1621_s12, 4  ;;  %s27_s16 = sshll.u32 %s1868_s1, 4  ;;  %s17_s13 = int_to_ptr.vmem [resolvable:$true] %s16_s13  ;;  %s28_s16 = int_to_ptr.hbm [resolvable:$true] %s27_s16 }
   0x4   :  { %s1622_s17 = smov 32   ;;  %s1623_s18 = smov 2  }
   0x5   :  { %22 = dma.hbm_to_vmem [thread:$0]  %s15_s11, 1024, %s17_s13, [#allocation3], %s1622_s17, %s1622_s17, %s1623_s18  }
   0x6   :  { %s1624_s19 = smov [#allocation5]   ;;  %s1625_s21 = smov 128  }
   0x7   :  { %s29_s20 = sshll.u32 %s1624_s19, 4  ;;  %s1626_s0 = smov 8   ;;  %s30_s20 = int_to_ptr.vmem [resolvable:$true] %s29_s20 }
   0x8   :  { %35 = dma.hbm_to_vmem [thread:$0]  %s28_s16, 2048, %s30_s20, [#allocation6], %s1625_s21, %s1625_s21, %s1626_s0  }
   0x9   :  { %1615 = dma.done.wait [#allocation3], 1024  }
   0xa   :  { %1616 = vsyncadd [#allocation3], 4294966272 }
   0xb   :  { %1617 = dma.done.wait [#allocation6], 2048  }
   0xc   :  { %1618 = vsyncadd [#allocation6], 4294965248  ;;  %v1653_v0 = vld [vmem:[#allocation5 + $0x18] sm:$0xff]  ;;  %v1661_v3 = vld [vmem:[#allocation5 + $0x10] sm:$0xff]  ;;  %v1627_v14 = vmov 0.0   ;;  %vm67_vm12 = vcmask 261120  }
   0xd   :  { %v1655_v1 = vld [vmem:[#allocation5 + $0x38] sm:$0xff]  ;;  %83 = vmatpush.msra.mxu0 %v1653_v0  ;;  %v1663_v4 = vld [vmem:[#allocation5 + $0x30] sm:$0xff]  ;;  %v1668_v6 = vld [vmem:[#allocation5 + $0x8] sm:$0xff]  ;;  %vm218_vm13 = vcmask 254976   ;;  %s1628_s1 = smov [#allocation7]   ;;  %s1325_s25 = sshll.u32 %s1869_s2, 4  ;;  %s1326_s25 = int_to_ptr.hbm [resolvable:$true] %s1325_s25 }
   0xe   :  { %v1657_v2 = vld [vmem:[#allocation5 + $0x78] sm:$0xff]  ;;  %123 = vmatpush.msra.mxu1 %v1655_v1  ;;  %v1665_v5 = vld [vmem:[#allocation5 + $0x70] sm:$0xff]  ;;  %v1670_v7 = vld [vmem:[#allocation5 + $0x28] sm:$0xff]  ;;  %s1323_s22 = sshll.u32 %s1628_s1, 4  ;;  %s1324_s22 = int_to_ptr.vmem [resolvable:$true] %s1323_s22 }
   0xf   :  { %185 = vmatpush.msra.mxu3 %v1657_v2  ;;  %84 = vmatpush.msra.mxu0 %v1661_v3  ;;  %v1674_v8 = vld [vmem:[#allocation5 + $0x68] sm:$0xff]  ;;  %v1677_v9 = vld [vmem:[#allocation5] sm:$0xff]  ;;  %v1681_v11 = vld [vmem:[#allocation5 + $0x58] sm:$0xff] }
  0x10   :  { %124 = vmatpush.msra.mxu1 %v1663_v4  ;;  %v1679_v10 = vld [vmem:[#allocation5 + $0x20] sm:$0xff]  ;;  %163 = vmatpush.msra.mxu2 %v1681_v11  ;;  %v1691_v13 = vld [vmem:[#allocation5 + $0x50] sm:$0xff]  ;;  %v1694_v15 = vld [vmem:[#allocation5 + $0x48] sm:$0xff] }
  0x11   :  { %186 = vmatpush.msra.mxu3 %v1665_v5  ;;  %85 = vmatpush.msra.mxu0 %v1668_v6  ;;  %v1685_v12 = vld [vmem:[#allocation5 + $0x60] sm:$0xff] }
  0x12   :  { %125 = vmatpush.msra.mxu1 %v1670_v7  ;;  %164 = vmatpush.msra.mxu2 %v1691_v13  ;;  %v1698_v16 = vld [vmem:[#allocation5 + $0x40] sm:$0xff] }
  0x13   :  { %187 = vmatpush.msra.mxu3 %v1674_v8  ;;  %86 = vmatpush.msra.mxu0 %v1677_v9  ;;  %v63_v17 = vld [vmem:[#allocation2] sm:$0x3]  ;;  %v64_v18 = vld [vmem:[#allocation2 + $0x2] sm:$0x3]  ;;  %v66_v25 = vld [vmem:[#allocation2 + $0x6] sm:$0x3] }
  0x14   :  { %126 = vmatpush.msra.mxu1 %v1679_v10  ;;  %87 = vmatmul.f32.vlgmr.msra.gmra.mxu0 %v1627_v14  ;;  %v65_v33 = vld [vmem:[#allocation2 + $0x4] sm:$0x3] }
  0x15   :  { %188 = vmatpush.msra.mxu3 %v1685_v12  ;;  %127 = vmatmul.f32.vlgmr.msra.gmra.mxu1 %v1627_v14 }
  0x16   :  { %189 = vmatmul.f32.vlgmr.msra.gmra.mxu3 %v1627_v14  ;;  %240 = vmatpush.msrb.mxu0 %v1653_v0 }
  0x17   :  { %280 = vmatpush.msrb.mxu1 %v1655_v1  ;;  %342 = vmatpush.msrb.mxu3 %v1657_v2 }
  0x18   :  { %165 = vmatpush.msra.mxu2 %v1694_v15  ;;  %241 = vmatpush.msrb.mxu0 %v1661_v3 }
  0x19   :  { %281 = vmatpush.msrb.mxu1 %v1663_v4  ;;  %343 = vmatpush.msrb.mxu3 %v1665_v5 }
  0x1a   :  { %166 = vmatpush.msra.mxu2 %v1698_v16  ;;  %242 = vmatpush.msrb.mxu0 %v1668_v6 }
  0x1b   :  { %167 = vmatmul.f32.vlgmr.msra.gmra.mxu2 %v1627_v14  ;;  %282 = vmatpush.msrb.mxu1 %v1670_v7 }
  0x1c   :  { %320 = vmatpush.msrb.mxu2 %v1681_v11  ;;  %344 = vmatpush.msrb.mxu3 %v1674_v8 }
  0x1d   :  { %243 = vmatpush.msrb.mxu0 %v1677_v9  ;;  %283 = vmatpush.msrb.mxu1 %v1679_v10 }
  0x1e   :  { %321 = vmatpush.msrb.mxu2 %v1691_v13  ;;  %345 = vmatpush.msrb.mxu3 %v1685_v12 }
  0x1f   :  { %397 = vmatpush.msra.mxu0 %v1653_v0  ;;  %437 = vmatpush.msra.mxu1 %v1655_v1 }
  0x20   :  { %322 = vmatpush.msrb.mxu2 %v1694_v15  ;;  %499 = vmatpush.msra.mxu3 %v1657_v2 }
  0x21   :  { %398 = vmatpush.msra.mxu0 %v1661_v3  ;;  %438 = vmatpush.msra.mxu1 %v1663_v4 }
  0x22   :  { %323 = vmatpush.msrb.mxu2 %v1698_v16  ;;  %500 = vmatpush.msra.mxu3 %v1665_v5 }
  0x23   :  { %399 = vmatpush.msra.mxu0 %v1668_v6  ;;  %439 = vmatpush.msra.mxu1 %v1670_v7 }
  0x24   :  { %477 = vmatpush.msra.mxu2 %v1681_v11  ;;  %501 = vmatpush.msra.mxu3 %v1674_v8 }
  0x25   :  { %400 = vmatpush.msra.mxu0 %v1677_v9  ;;  %440 = vmatpush.msra.mxu1 %v1679_v10 }
  0x26   :  { %478 = vmatpush.msra.mxu2 %v1691_v13  ;;  %502 = vmatpush.msra.mxu3 %v1685_v12 }
  0x28   :  { %479 = vmatpush.msra.mxu2 %v1694_v15 }
  0x2a   :  { %480 = vmatpush.msra.mxu2 %v1698_v16 }
  0x91   :  { %v88_v19 = vpop.f32.mrf.mxu0 }
  0x92   :  { %v91_v20 = vadd.f32 %v88_v19, %v63_v17  ;;  %v128_v21 = vpop.f32.mrf.mxu1 }
  0x93   :  { %v131_v22 = vadd.f32 %v128_v21, %v64_v18 }
  0x94   :  { %v1339_v23 = vmul.f32 -1.442695, %v91_v20 }
  0x95   :  { %v1340_v24 = vmul.f32 -1.442695, %v131_v22 }
  0x96   :  { %1399 = vpow2.f32 %v1339_v23 }
  0x97   :  { %1401 = vpow2.f32 %v1340_v24 }
  0x99   :  { %v190_v26 = vpop.f32.mrf.mxu3 }
  0x9a   :  { %v193_v27 = vadd.f32 %v190_v26, %v66_v25  ;;  %v221_v26 = vld [vmem:[#allocation2 + $0x8] sm:$0x3] }
  0x9c   :  { %v1341_v28 = vmul.f32 -1.442695, %v193_v27  ;;  %v1400_v29 = vpop.eup %1399  ;;  %v222_v27 = vld [vmem:[#allocation2 + $0xa] sm:$0x3] }
  0x9d   :  { %v1402_v30 = vpop.eup %1401  ;;  %v95_v31 = vadd.f32 1.0, %v1400_v29 }
  0x9e   :  { %1403 = vpow2.f32 %v1341_v28  ;;  %v135_v32 = vadd.f32 1.0, %v1402_v30  ;;  %v168_v34 = vpop.f32.mrf.mxu2 }
  0x9f   :  { %1405 = vrcp.f32 %v95_v31  ;;  %v171_v36 = vadd.f32 %v168_v34, %v65_v33  ;;  %v107_v44 = vand.u32 2147483648, %v95_v31  ;;  %v105_v47 = vand.u32 2147483647, %v95_v31  ;;  %v224_v34 = vld [vmem:[#allocation2 + $0xe] sm:$0x3] }
  0xa0   :  { %1407 = vrcp.f32 %v135_v32  ;;  %v147_v45 = vand.u32 2147483648, %v135_v32  ;;  %v145_v49 = vand.u32 2147483647, %v135_v32  ;;  %vm101_vm2 = vweird.f32 %v95_v31 }
  0xa1   :  { %vm141_vm3 = vweird.f32 %v135_v32  ;;  %v108_v54 = vor.u32 1.1754944e-38, %v107_v44  ;;  %vm106_vm5 = vcmp.eq.f32.partialorder %v105_v47, 8.507059e+37 }
  0xa2   :  { %v148_v56 = vor.u32 1.1754944e-38, %v147_v45  ;;  %vm146_vm7 = vcmp.eq.f32.partialorder %v145_v49, 8.507059e+37 }
  0xa4   :  { %v1404_v35 = vpop.eup %1403 }
  0xa5   :  { %v197_v37 = vadd.f32 1.0, %v1404_v35  ;;  %v1406_v38 = vpop.eup %1405 }
  0xa6   :  { %v1408_v39 = vpop.eup %1407  ;;  %v97_v40 = vmul.f32 %v1406_v38, %v95_v31  ;;  %vm102_vm0 = vweird.f32 %v1406_v38 }
  0xa7   :  { %1409 = vrcp.f32 %v197_v37  ;;  %v137_v41 = vmul.f32 %v1408_v39, %v135_v32  ;;  %vm142_vm1 = vweird.f32 %v1408_v39  ;;  %vm103_vm4 = vmor %vm101_vm2, %vm102_vm0  ;;  %v209_v19 = vand.u32 2147483648, %v197_v37 }
  0xa8   :  { %1411 = vtanh.f32 %v171_v36  ;;  %v98_v42 = vsub.f32 1.0, %v97_v40  ;;  %vm143_vm6 = vmor %vm141_vm3, %vm142_vm1  ;;  %vm203_vm9 = vweird.f32 %v197_v37  ;;  %v207_v20 = vand.u32 2147483647, %v197_v37 }
  0xa9   :  { %v138_v43 = vsub.f32 1.0, %v137_v41  ;;  %v210_v22 = vor.u32 1.1754944e-38, %v209_v19 }
  0xaa   :  { %v99_v46 = vmul.f32 %v1406_v38, %v98_v42  ;;  %vm208_vm11 = vcmp.eq.f32.partialorder %v207_v20, 8.507059e+37  ;;  %v223_v42 = vld [vmem:[#allocation2 + $0xc] sm:$0x3] }
  0xab   :  { %v139_v48 = vmul.f32 %v1408_v39, %v138_v43 }
  0xac   :  { %v100_v51 = vadd.f32 %v1406_v38, %v99_v46 }
  0xad   :  { %v1410_v50 = vpop.eup %1409  ;;  %v140_v55 = vadd.f32 %v1408_v39, %v139_v48 }
  0xae   :  { %v1412_v52 = vpop.eup %1411  ;;  %v199_v53 = vmul.f32 %v1410_v50, %v197_v37  ;;  %v104_v57 = vsel %vm103_vm4, %v1406_v38, %v100_v51  ;;  %vm204_vm8 = vweird.f32 %v1410_v50 }
  0xaf   :  { %v109_v59 = vsel %vm106_vm5, %v108_v54, %v104_v57  ;;  %v144_v60 = vsel %vm143_vm6, %v1408_v39, %v140_v55  ;;  %vm205_vm10 = vmor %vm203_vm9, %vm204_vm8 }
  0xb0   :  { %v200_v58 = vsub.f32 1.0, %v199_v53  ;;  %v149_v61 = vsel %vm146_vm7, %v148_v56, %v144_v60  ;;  %v214_v62 = vmul.f32 %v1412_v52, %v109_v59 }
  0xb1   :  { %v213_v14 = vmul.f32 0.0, %v149_v61 }
  0xb2   :  { %v201_v63 = vmul.f32 %v1410_v50, %v200_v58 }
  0xb3   :  { %v1733_v17 = vadd.f32 %v214_v62, %v213_v14 }
  0xb4   :  { %v202_v18 = vadd.f32 %v1410_v50, %v201_v63 }
  0xb5   :  { %1413 = vtanh.f32 %v1733_v17 }
  0xb6   :  { %v206_v21 = vsel %vm205_vm10, %v1410_v50, %v202_v18 }
  0xb7   :  { %v211_v24 = vsel %vm208_vm11, %v210_v22, %v206_v21 }
  0xbb   :  { %v1414_v23 = vpop.eup %1413 }
  0xbc   :  { %v217_v25 = vmul.f32 %v1414_v23, %v211_v24 }
  0xbe   :  { %219 = vst.msk [vmem:[#allocation7] sm:$0x3] %vm218_vm13, %v217_v25  ;;  %1342 = vmatmul.msk.f32.vlgmr.msrb.gmra.mxu0 %vm67_vm12, %v217_v25  ;;  %1344 = vmatmul.msk.f32.vlgmr.msrb.gmra.mxu1 %vm67_vm12, %v217_v25 }
  0xbf   :  { %1346 = vmatmul.msk.f32.vlgmr.msrb.gmra.mxu2 %vm67_vm12, %v217_v25  ;;  %1347 = vmatmul.msk.f32.vlgmr.msrb.gmra.mxu3 %vm67_vm12, %v217_v25 }
  0xc0   :  { %554 = vmatpush.msrb.mxu0 %v1653_v0  ;;  %594 = vmatpush.msrb.mxu1 %v1655_v1 }
  0xc1   :  { %634 = vmatpush.msrb.mxu2 %v1681_v11  ;;  %656 = vmatpush.msrb.mxu3 %v1657_v2 }
  0xc2   :  { %555 = vmatpush.msrb.mxu0 %v1661_v3  ;;  %595 = vmatpush.msrb.mxu1 %v1663_v4 }
  0xc3   :  { %635 = vmatpush.msrb.mxu2 %v1691_v13  ;;  %657 = vmatpush.msrb.mxu3 %v1665_v5 }
  0xc4   :  { %556 = vmatpush.msrb.mxu0 %v1668_v6  ;;  %596 = vmatpush.msrb.mxu1 %v1670_v7 }
  0xc5   :  { %636 = vmatpush.msrb.mxu2 %v1694_v15  ;;  %658 = vmatpush.msrb.mxu3 %v1674_v8 }
  0xc6   :  { %557 = vmatpush.msrb.mxu0 %v1677_v9  ;;  %597 = vmatpush.msrb.mxu1 %v1679_v10 }
  0xc7   :  { %637 = vmatpush.msrb.mxu2 %v1698_v16  ;;  %659 = vmatpush.msrb.mxu3 %v1685_v12 }
 0x13b   :  { %v245_v28 = vpop.f32.mrf.mxu0  ;;  %v285_v29 = vpop.f32.mrf.mxu1 }
 0x13c   :  { %v248_v30 = vadd.f32 %v245_v28, %v221_v26  ;;  %v288_v31 = vadd.f32 %v285_v29, %v222_v27 }
 0x13e   :  { %v1343_v32 = vmul.f32 -1.442695, %v248_v30  ;;  %v1345_v33 = vmul.f32 -1.442695, %v288_v31 }
 0x140   :  { %1415 = vpow2.f32 %v1343_v32 }
 0x141   :  { %1417 = vpow2.f32 %v1345_v33 }
 0x142   :  { %v347_v35 = vpop.f32.mrf.mxu3  ;;  %v325_v43 = vpop.f32.mrf.mxu2 }
 0x143   :  { %v350_v36 = vadd.f32 %v347_v35, %v224_v34  ;;  %v328_v47 = vadd.f32 %v325_v43, %v223_v42  ;;  %v381_v43 = vld [vmem:[#allocation2 + $0x16] sm:$0x3] }
 0x145   :  { %v1348_v37 = vmul.f32 -1.442695, %v350_v36  ;;  %v379_v36 = vld [vmem:[#allocation2 + $0x12] sm:$0x3] }
 0x146   :  { %v1416_v38 = vpop.eup %1415 }
 0x147   :  { %v1418_v39 = vpop.eup %1417  ;;  %v252_v40 = vadd.f32 1.0, %v1416_v38  ;;  %1419 = vpow2.f32 %v1348_v37 }
 0x148   :  { %v292_v41 = vadd.f32 1.0, %v1418_v39 }
 0x149   :  { %1421 = vrcp.f32 %v252_v40  ;;  %v264_v53 = vand.u32 2147483648, %v252_v40  ;;  %v262_v56 = vand.u32 2147483647, %v252_v40  ;;  %vm258_vm0 = vweird.f32 %v252_v40 }
 0x14a   :  { %1423 = vrcp.f32 %v292_v41  ;;  %v304_v54 = vand.u32 2147483648, %v292_v41  ;;  %v302_v58 = vand.u32 2147483647, %v292_v41  ;;  %vm298_vm1 = vweird.f32 %v292_v41 }
 0x14b   :  { %v265_v61 = vor.u32 1.1754944e-38, %v264_v53  ;;  %vm263_vm4 = vcmp.eq.f32.partialorder %v262_v56, 8.507059e+37 }
 0x14c   :  { %v305_v14 = vor.u32 1.1754944e-38, %v304_v54  ;;  %vm303_vm5 = vcmp.eq.f32.partialorder %v302_v58, 8.507059e+37 }
 0x14d   :  { %v1420_v44 = vpop.eup %1419 }
 0x14e   :  { %v354_v45 = vadd.f32 1.0, %v1420_v44 }
 0x14f   :  { %v1422_v46 = vpop.eup %1421 }
 0x150   :  { %v1424_v48 = vpop.eup %1423  ;;  %v254_v49 = vmul.f32 %v1422_v46, %v252_v40  ;;  %1425 = vrcp.f32 %v354_v45  ;;  %vm259_vm14 = vweird.f32 %v1422_v46  ;;  %v366_v29 = vand.u32 2147483648, %v354_v45 }
 0x151   :  { %v294_v50 = vmul.f32 %v1424_v48, %v292_v41  ;;  %1427 = vtanh.f32 %v328_v47  ;;  %vm299_vm15 = vweird.f32 %v1424_v48  ;;  %vm260_vm2 = vmor %vm258_vm0, %vm259_vm14  ;;  %vm360_vm7 = vweird.f32 %v354_v45 }
 0x152   :  { %v255_v51 = vsub.f32 1.0, %v254_v49  ;;  %vm300_vm3 = vmor %vm298_vm1, %vm299_vm15  ;;  %v364_v30 = vand.u32 2147483647, %v354_v45  ;;  %v367_v32 = vor.u32 1.1754944e-38, %v366_v29 }
 0x153   :  { %v295_v52 = vsub.f32 1.0, %v294_v50 }
 0x154   :  { %v256_v55 = vmul.f32 %v1422_v46, %v255_v51  ;;  %vm365_vm9 = vcmp.eq.f32.partialorder %v364_v30, 8.507059e+37  ;;  %v380_v51 = vld [vmem:[#allocation2 + $0x14] sm:$0x3] }
 0x155   :  { %v296_v57 = vmul.f32 %v1424_v48, %v295_v52 }
 0x156   :  { %v1426_v59 = vpop.eup %1425  ;;  %v257_v60 = vadd.f32 %v1422_v46, %v256_v55 }
 0x157   :  { %v297_v62 = vadd.f32 %v1424_v48, %v296_v57  ;;  %v356_v63 = vmul.f32 %v1426_v59, %v354_v45  ;;  %v1428_v19 = vpop.eup %1427  ;;  %vm361_vm6 = vweird.f32 %v1426_v59 }
 0x158   :  { %v261_v18 = vsel %vm260_vm2, %v1422_v46, %v257_v60  ;;  %vm362_vm8 = vmor %vm360_vm7, %vm361_vm6 }
 0x159   :  { %v266_v20 = vsel %vm263_vm4, %v265_v61, %v261_v18  ;;  %v301_v21 = vsel %vm300_vm3, %v1424_v48, %v297_v62  ;;  %v357_v22 = vsub.f32 1.0, %v356_v63 }
 0x15a   :  { %v306_v23 = vsel %vm303_vm5, %v305_v14, %v301_v21  ;;  %v371_v24 = vmul.f32 %v1428_v19, %v266_v20 }
 0x15b   :  { %v370_v25 = vmul.f32 %v306_v23, %v1733_v17  ;;  %v358_v26 = vmul.f32 %v1426_v59, %v357_v22  ;;  %v378_v17 = vld [vmem:[#allocation2 + $0x10] sm:$0x3] }
 0x15d   :  { %v1758_v27 = vadd.f32 %v371_v24, %v370_v25  ;;  %v359_v28 = vadd.f32 %v1426_v59, %v358_v26 }
 0x15f   :  { %1429 = vtanh.f32 %v1758_v27  ;;  %v363_v31 = vsel %vm362_vm8, %v1426_v59, %v359_v28 }
 0x160   :  { %v368_v34 = vsel %vm365_vm9, %v367_v32, %v363_v31 }
 0x165   :  { %v1430_v33 = vpop.eup %1429 }
 0x166   :  { %v374_v35 = vmul.f32 %v1430_v33, %v368_v34 }
 0x168   :  { %376 = vst.msk [vmem:[#allocation7 + $0x2] sm:$0x3] %vm218_vm13, %v374_v35  ;;  %1349 = vmatmul.msk.f32.vlgmr.msra.gmra.mxu0 %vm67_vm12, %v374_v35  ;;  %1351 = vmatmul.msk.f32.vlgmr.msra.gmra.mxu1 %vm67_vm12, %v374_v35 }
 0x169   :  { %1353 = vmatmul.msk.f32.vlgmr.msra.gmra.mxu2 %vm67_vm12, %v374_v35  ;;  %1354 = vmatmul.msk.f32.vlgmr.msra.gmra.mxu3 %vm67_vm12, %v374_v35 }
 0x16a   :  { %711 = vmatpush.msra.mxu0 %v1653_v0  ;;  %751 = vmatpush.msra.mxu1 %v1655_v1 }
 0x16b   :  { %791 = vmatpush.msra.mxu2 %v1681_v11  ;;  %813 = vmatpush.msra.mxu3 %v1657_v2 }
 0x16c   :  { %712 = vmatpush.msra.mxu0 %v1661_v3  ;;  %752 = vmatpush.msra.mxu1 %v1663_v4 }
 0x16d   :  { %792 = vmatpush.msra.mxu2 %v1691_v13  ;;  %814 = vmatpush.msra.mxu3 %v1665_v5 }
 0x16e   :  { %713 = vmatpush.msra.mxu0 %v1668_v6  ;;  %753 = vmatpush.msra.mxu1 %v1670_v7 }
 0x16f   :  { %793 = vmatpush.msra.mxu2 %v1694_v15  ;;  %815 = vmatpush.msra.mxu3 %v1674_v8 }
 0x170   :  { %714 = vmatpush.msra.mxu0 %v1677_v9  ;;  %754 = vmatpush.msra.mxu1 %v1679_v10 }
 0x171   :  { %794 = vmatpush.msra.mxu2 %v1698_v16  ;;  %816 = vmatpush.msra.mxu3 %v1685_v12 }
 0x1e5   :  { %v402_v37 = vpop.f32.mrf.mxu0  ;;  %v442_v38 = vpop.f32.mrf.mxu1 }
 0x1e6   :  { %v405_v39 = vadd.f32 %v402_v37, %v378_v17  ;;  %v445_v40 = vadd.f32 %v442_v38, %v379_v36 }
 0x1e8   :  { %v1350_v41 = vmul.f32 -1.442695, %v405_v39  ;;  %v1352_v42 = vmul.f32 -1.442695, %v445_v40 }
 0x1ea   :  { %1431 = vpow2.f32 %v1350_v41 }
 0x1eb   :  { %1433 = vpow2.f32 %v1352_v42 }
 0x1ec   :  { %v504_v44 = vpop.f32.mrf.mxu3  ;;  %v482_v52 = vpop.f32.mrf.mxu2 }
 0x1ed   :  { %v507_v45 = vadd.f32 %v504_v44, %v381_v43  ;;  %v485_v56 = vadd.f32 %v482_v52, %v380_v51  ;;  %v538_v52 = vld [vmem:[#allocation2 + $0x1e] sm:$0x3] }
 0x1ef   :  { %v1355_v46 = vmul.f32 -1.442695, %v507_v45  ;;  %v536_v45 = vld [vmem:[#allocation2 + $0x1a] sm:$0x3] }
 0x1f0   :  { %v1432_v47 = vpop.eup %1431 }
 0x1f1   :  { %v1434_v48 = vpop.eup %1433  ;;  %v409_v49 = vadd.f32 1.0, %v1432_v47  ;;  %1435 = vpow2.f32 %v1355_v46 }
 0x1f2   :  { %v449_v50 = vadd.f32 1.0, %v1434_v48 }
 0x1f3   :  { %1437 = vrcp.f32 %v409_v49  ;;  %v421_v62 = vand.u32 2147483648, %v409_v49  ;;  %v419_v18 = vand.u32 2147483647, %v409_v49  ;;  %vm415_vm14 = vweird.f32 %v409_v49 }
 0x1f4   :  { %1439 = vrcp.f32 %v449_v50  ;;  %v461_v63 = vand.u32 2147483648, %v449_v50  ;;  %v459_v20 = vand.u32 2147483647, %v449_v50  ;;  %vm455_vm15 = vweird.f32 %v449_v50 }
 0x1f5   :  { %v422_v23 = vor.u32 1.1754944e-38, %v421_v62  ;;  %vm420_vm2 = vcmp.eq.f32.partialorder %v419_v18, 8.507059e+37 }
 0x1f6   :  { %v462_v26 = vor.u32 1.1754944e-38, %v461_v63  ;;  %vm460_vm3 = vcmp.eq.f32.partialorder %v459_v20, 8.507059e+37 }
 0x1f7   :  { %v1436_v53 = vpop.eup %1435 }
 0x1f8   :  { %v511_v54 = vadd.f32 1.0, %v1436_v53 }
 0x1f9   :  { %v1438_v55 = vpop.eup %1437 }
 0x1fa   :  { %v1440_v57 = vpop.eup %1439  ;;  %v411_v58 = vmul.f32 %v1438_v55, %v409_v49  ;;  %1441 = vrcp.f32 %v511_v54  ;;  %vm416_vm10 = vweird.f32 %v1438_v55  ;;  %v523_v38 = vand.u32 2147483648, %v511_v54 }
 0x1fb   :  { %v451_v59 = vmul.f32 %v1440_v57, %v449_v50  ;;  %1443 = vtanh.f32 %v485_v56  ;;  %vm456_vm11 = vweird.f32 %v1440_v57  ;;  %vm417_vm0 = vmor %vm415_vm14, %vm416_vm10  ;;  %vm517_vm5 = vweird.f32 %v511_v54 }
 0x1fc   :  { %v412_v60 = vsub.f32 1.0, %v411_v58  ;;  %vm457_vm1 = vmor %vm455_vm15, %vm456_vm11  ;;  %v521_v39 = vand.u32 2147483647, %v511_v54  ;;  %v524_v41 = vor.u32 1.1754944e-38, %v523_v38 }
 0x1fd   :  { %v452_v61 = vsub.f32 1.0, %v451_v59 }
 0x1fe   :  { %v413_v14 = vmul.f32 %v1438_v55, %v412_v60  ;;  %vm522_vm7 = vcmp.eq.f32.partialorder %v521_v39, 8.507059e+37  ;;  %v537_v60 = vld [vmem:[#allocation2 + $0x1c] sm:$0x3] }
 0x1ff   :  { %v453_v19 = vmul.f32 %v1440_v57, %v452_v61 }
 0x200   :  { %v1442_v21 = vpop.eup %1441  ;;  %v414_v22 = vadd.f32 %v1438_v55, %v413_v14 }
 0x201   :  { %v454_v24 = vadd.f32 %v1440_v57, %v453_v19  ;;  %v513_v25 = vmul.f32 %v1442_v21, %v511_v54  ;;  %v1444_v29 = vpop.eup %1443  ;;  %vm518_vm4 = vweird.f32 %v1442_v21 }
 0x202   :  { %v418_v28 = vsel %vm417_vm0, %v1438_v55, %v414_v22  ;;  %vm519_vm6 = vmor %vm517_vm5, %vm518_vm4 }
 0x203   :  { %v423_v30 = vsel %vm420_vm2, %v422_v23, %v418_v28  ;;  %v458_v31 = vsel %vm457_vm1, %v1440_v57, %v454_v24  ;;  %v514_v32 = vsub.f32 1.0, %v513_v25 }
 0x204   :  { %v463_v33 = vsel %vm460_vm3, %v462_v26, %v458_v31  ;;  %v528_v34 = vmul.f32 %v1444_v29, %v423_v30 }
 0x205   :  { %v527_v35 = vmul.f32 %v463_v33, %v1758_v27  ;;  %v515_v17 = vmul.f32 %v1442_v21, %v514_v32  ;;  %v535_v27 = vld [vmem:[#allocation2 + $0x18] sm:$0x3] }
 0x207   :  { %v1783_v36 = vadd.f32 %v528_v34, %v527_v35  ;;  %v516_v37 = vadd.f32 %v1442_v21, %v515_v17 }
 0x209   :  { %1445 = vtanh.f32 %v1783_v36  ;;  %v520_v40 = vsel %vm519_vm6, %v1442_v21, %v516_v37 }
 0x20a   :  { %v525_v43 = vsel %vm522_vm7, %v524_v41, %v520_v40 }
 0x20f   :  { %v1446_v42 = vpop.eup %1445 }
 0x210   :  { %v531_v44 = vmul.f32 %v1446_v42, %v525_v43 }
 0x212   :  { %533 = vst.msk [vmem:[#allocation7 + $0x4] sm:$0x3] %vm218_vm13, %v531_v44  ;;  %1356 = vmatmul.msk.f32.vlgmr.msrb.gmra.mxu0 %vm67_vm12, %v531_v44  ;;  %1358 = vmatmul.msk.f32.vlgmr.msrb.gmra.mxu1 %vm67_vm12, %v531_v44 }
 0x213   :  { %1360 = vmatmul.msk.f32.vlgmr.msrb.gmra.mxu2 %vm67_vm12, %v531_v44  ;;  %1361 = vmatmul.msk.f32.vlgmr.msrb.gmra.mxu3 %vm67_vm12, %v531_v44 }
 0x214   :  { %868 = vmatpush.msrb.mxu0 %v1653_v0  ;;  %908 = vmatpush.msrb.mxu1 %v1655_v1 }
 0x215   :  { %948 = vmatpush.msrb.mxu2 %v1681_v11  ;;  %970 = vmatpush.msrb.mxu3 %v1657_v2 }
 0x216   :  { %869 = vmatpush.msrb.mxu0 %v1661_v3  ;;  %909 = vmatpush.msrb.mxu1 %v1663_v4 }
 0x217   :  { %949 = vmatpush.msrb.mxu2 %v1691_v13  ;;  %971 = vmatpush.msrb.mxu3 %v1665_v5 }
 0x218   :  { %870 = vmatpush.msrb.mxu0 %v1668_v6  ;;  %910 = vmatpush.msrb.mxu1 %v1670_v7 }
 0x219   :  { %950 = vmatpush.msrb.mxu2 %v1694_v15  ;;  %972 = vmatpush.msrb.mxu3 %v1674_v8 }
 0x21a   :  { %871 = vmatpush.msrb.mxu0 %v1677_v9  ;;  %911 = vmatpush.msrb.mxu1 %v1679_v10 }
 0x21b   :  { %951 = vmatpush.msrb.mxu2 %v1698_v16  ;;  %973 = vmatpush.msrb.mxu3 %v1685_v12 }
 0x28f   :  { %v559_v46 = vpop.f32.mrf.mxu0  ;;  %v599_v47 = vpop.f32.mrf.mxu1 }
 0x290   :  { %v562_v48 = vadd.f32 %v559_v46, %v535_v27  ;;  %v602_v49 = vadd.f32 %v599_v47, %v536_v45 }
 0x292   :  { %v1357_v50 = vmul.f32 -1.442695, %v562_v48  ;;  %v1359_v51 = vmul.f32 -1.442695, %v602_v49 }
 0x294   :  { %1447 = vpow2.f32 %v1357_v50 }
 0x295   :  { %1449 = vpow2.f32 %v1359_v51 }
 0x296   :  { %v661_v53 = vpop.f32.mrf.mxu3  ;;  %v639_v61 = vpop.f32.mrf.mxu2 }
 0x297   :  { %v664_v54 = vadd.f32 %v661_v53, %v538_v52  ;;  %v642_v18 = vadd.f32 %v639_v61, %v537_v60 }
 0x299   :  { %v1362_v55 = vmul.f32 -1.442695, %v664_v54 }
 0x29a   :  { %v1448_v56 = vpop.eup %1447 }
 0x29b   :  { %v1450_v57 = vpop.eup %1449  ;;  %v566_v58 = vadd.f32 1.0, %v1448_v56  ;;  %1451 = vpow2.f32 %v1362_v55 }
 0x29c   :  { %v606_v59 = vadd.f32 1.0, %v1450_v57 }
 0x29d   :  { %1453 = vrcp.f32 %v566_v58  ;;  %v578_v24 = vand.u32 2147483648, %v566_v58  ;;  %v576_v28 = vand.u32 2147483647, %v566_v58  ;;  %vm572_vm10 = vweird.f32 %v566_v58 }
 0x29e   :  { %1455 = vrcp.f32 %v606_v59  ;;  %v618_v25 = vand.u32 2147483648, %v606_v59  ;;  %v616_v30 = vand.u32 2147483647, %v606_v59  ;;  %vm612_vm11 = vweird.f32 %v606_v59 }
 0x29f   :  { %v579_v33 = vor.u32 1.1754944e-38, %v578_v24  ;;  %vm577_vm0 = vcmp.eq.f32.partialorder %v576_v28, 8.507059e+37 }
 0x2a0   :  { %v619_v17 = vor.u32 1.1754944e-38, %v618_v25  ;;  %vm617_vm1 = vcmp.eq.f32.partialorder %v616_v30, 8.507059e+37 }
 0x2a1   :  { %v1452_v62 = vpop.eup %1451 }
 0x2a2   :  { %v668_v63 = vadd.f32 1.0, %v1452_v62 }
 0x2a3   :  { %v1454_v14 = vpop.eup %1453 }
 0x2a4   :  { %v1456_v19 = vpop.eup %1455  ;;  %v568_v20 = vmul.f32 %v1454_v14, %v566_v58  ;;  %1457 = vrcp.f32 %v668_v63  ;;  %vm573_vm8 = vweird.f32 %v1454_v14  ;;  %v680_v47 = vand.u32 2147483648, %v668_v63 }
 0x2a5   :  { %v608_v21 = vmul.f32 %v1456_v19, %v606_v59  ;;  %1459 = vtanh.f32 %v642_v18  ;;  %vm613_vm9 = vweird.f32 %v1456_v19  ;;  %vm574_vm14 = vmor %vm572_vm10, %vm573_vm8  ;;  %vm674_vm3 = vweird.f32 %v668_v63 }
 0x2a6   :  { %v569_v22 = vsub.f32 1.0, %v568_v20  ;;  %vm614_vm15 = vmor %vm612_vm11, %vm613_vm9  ;;  %v678_v48 = vand.u32 2147483647, %v668_v63  ;;  %v681_v50 = vor.u32 1.1754944e-38, %v680_v47 }
 0x2a7   :  { %v609_v23 = vsub.f32 1.0, %v608_v21 }
 0x2a8   :  { %v570_v26 = vmul.f32 %v1454_v14, %v569_v22  ;;  %vm679_vm5 = vcmp.eq.f32.partialorder %v678_v48, 8.507059e+37  ;;  %v1528_v48 = vld [vmem:[#allocation5 + $0x38] sm:$0xff] }
 0x2a9   :  { %v610_v29 = vmul.f32 %v1456_v19, %v609_v23 }
 0x2aa   :  { %v1458_v31 = vpop.eup %1457  ;;  %v571_v32 = vadd.f32 %v1454_v14, %v570_v26 }
 0x2ab   :  { %v611_v34 = vadd.f32 %v1456_v19, %v610_v29  ;;  %v670_v35 = vmul.f32 %v1458_v31, %v668_v63  ;;  %v1460_v38 = vpop.eup %1459  ;;  %vm675_vm2 = vweird.f32 %v1458_v31 }
 0x2ac   :  { %v575_v37 = vsel %vm574_vm14, %v1454_v14, %v571_v32  ;;  %vm676_vm4 = vmor %vm674_vm3, %vm675_vm2 }
 0x2ad   :  { %v580_v39 = vsel %vm577_vm0, %v579_v33, %v575_v37  ;;  %v615_v40 = vsel %vm614_vm15, %v1456_v19, %v611_v34  ;;  %v671_v41 = vsub.f32 1.0, %v670_v35 }
 0x2ae   :  { %v620_v42 = vsel %vm617_vm1, %v619_v17, %v615_v40  ;;  %v685_v43 = vmul.f32 %v1460_v38, %v580_v39 }
 0x2af   :  { %v684_v44 = vmul.f32 %v620_v42, %v1783_v36  ;;  %v672_v27 = vmul.f32 %v1458_v31, %v671_v41 }
 0x2b1   :  { %v1808_v45 = vadd.f32 %v685_v43, %v684_v44  ;;  %v673_v46 = vadd.f32 %v1458_v31, %v672_v27 }
 0x2b3   :  { %1461 = vtanh.f32 %v1808_v45  ;;  %v677_v49 = vsel %vm676_vm4, %v1458_v31, %v673_v46 }
 0x2b4   :  { %v682_v52 = vsel %vm679_vm5, %v681_v50, %v677_v49  ;;  %v1529_v49 = vld [vmem:[#allocation5 + $0x58] sm:$0xff] }
 0x2b5   :  { %v1530_v50 = vld [vmem:[#allocation5 + $0x78] sm:$0xff] }
 0x2b9   :  { %v1462_v51 = vpop.eup %1461 }
 0x2ba   :  { %v688_v53 = vmul.f32 %v1462_v51, %v682_v52  ;;  %v1531_v51 = vld [vmem:[#allocation5 + $0x10] sm:$0xff] }
 0x2bb   :  { %v1532_v52 = vld [vmem:[#allocation5 + $0x30] sm:$0xff] }
 0x2bc   :  { %690 = vst.msk [vmem:[#allocation7 + $0x6] sm:$0x3] %vm218_vm13, %v688_v53  ;;  %1363 = vmatmul.msk.f32.vlgmr.msra.gmra.mxu0 %vm67_vm12, %v688_v53  ;;  %1365 = vmatmul.msk.f32.vlgmr.msra.gmra.mxu1 %vm67_vm12, %v688_v53 }
 0x2bd   :  { %1367 = vmatmul.msk.f32.vlgmr.msra.gmra.mxu2 %vm67_vm12, %v688_v53  ;;  %1368 = vmatmul.msk.f32.vlgmr.msra.gmra.mxu3 %vm67_vm12, %v688_v53  ;;  %v1533_v53 = vld [vmem:[#allocation5 + $0x50] sm:$0xff] }
 0x2be   :  { %1025 = vmatpush.msra.mxu0 %v1653_v0  ;;  %1065 = vmatpush.msra.mxu1 %v1655_v1  ;;  %v692_v0 = vld [vmem:[#allocation2 + $0x20] sm:$0x3]  ;;  %v693_v1 = vld [vmem:[#allocation2 + $0x22] sm:$0x3] }
 0x2bf   :  { %1105 = vmatpush.msra.mxu2 %v1681_v11  ;;  %1127 = vmatpush.msra.mxu3 %v1657_v2  ;;  %v695_v11 = vld [vmem:[#allocation2 + $0x26] sm:$0x3] }
 0x2c0   :  { %1026 = vmatpush.msra.mxu0 %v1661_v3  ;;  %1066 = vmatpush.msra.mxu1 %v1663_v4 }
 0x2c1   :  { %1106 = vmatpush.msra.mxu2 %v1691_v13  ;;  %1128 = vmatpush.msra.mxu3 %v1665_v5 }
 0x2c2   :  { %1027 = vmatpush.msra.mxu0 %v1668_v6  ;;  %1067 = vmatpush.msra.mxu1 %v1670_v7 }
 0x2c3   :  { %1107 = vmatpush.msra.mxu2 %v1694_v15  ;;  %1129 = vmatpush.msra.mxu3 %v1674_v8 }
 0x2c4   :  { %1028 = vmatpush.msra.mxu0 %v1677_v9  ;;  %1068 = vmatpush.msra.mxu1 %v1679_v10 }
 0x2c5   :  { %1108 = vmatpush.msra.mxu2 %v1698_v16  ;;  %1130 = vmatpush.msra.mxu3 %v1685_v12  ;;  %v694_v12 = vld [vmem:[#allocation2 + $0x24] sm:$0x3] }
 0x339   :  { %v716_v2 = vpop.f32.mrf.mxu0  ;;  %v756_v3 = vpop.f32.mrf.mxu1 }
 0x33a   :  { %v719_v4 = vadd.f32 %v716_v2, %v692_v0  ;;  %v759_v5 = vadd.f32 %v756_v3, %v693_v1  ;;  %v1534_v0 = vld [vmem:[#allocation5 + $0x70] sm:$0xff]  ;;  %v1535_v1 = vld [vmem:[#allocation5 + $0x8] sm:$0xff] }
 0x33b   :  { %v1536_v2 = vld [vmem:[#allocation5 + $0x28] sm:$0xff] }
 0x33c   :  { %v1364_v6 = vmul.f32 -1.442695, %v719_v4  ;;  %v1366_v7 = vmul.f32 -1.442695, %v759_v5  ;;  %v1537_v3 = vld [vmem:[#allocation5 + $0x48] sm:$0xff]  ;;  %v1539_v5 = vld [vmem:[#allocation5] sm:$0xff] }
 0x33d   :  { %v1538_v4 = vld [vmem:[#allocation5 + $0x68] sm:$0xff] }
 0x33e   :  { %1463 = vpow2.f32 %v1364_v6  ;;  %v1540_v6 = vld [vmem:[#allocation5 + $0x20] sm:$0xff] }
 0x33f   :  { %1465 = vpow2.f32 %v1366_v7  ;;  %v1541_v7 = vld [vmem:[#allocation5 + $0x40] sm:$0xff] }
 0x340   :  { %v818_v8 = vpop.f32.mrf.mxu3  ;;  %v796_v54 = vpop.f32.mrf.mxu2 }
 0x341   :  { %v821_v13 = vadd.f32 %v818_v8, %v695_v11  ;;  %v799_v58 = vadd.f32 %v796_v54, %v694_v12  ;;  %v1542_v11 = vld [vmem:[#allocation5 + $0x60] sm:$0xff]  ;;  %v849_v8 = vld [vmem:[#allocation2 + $0x28] sm:$0x3]  ;;  %v852_v54 = vld [vmem:[#allocation2 + $0x2e] sm:$0x3] }
 0x343   :  { %v1369_v9 = vmul.f32 -1.442695, %v821_v13  ;;  %v850_v13 = vld [vmem:[#allocation2 + $0x2a] sm:$0x3] }
 0x344   :  { %v1464_v15 = vpop.eup %1463 }
 0x345   :  { %v1466_v10 = vpop.eup %1465  ;;  %v723_v36 = vadd.f32 1.0, %v1464_v15  ;;  %1467 = vpow2.f32 %v1369_v9 }
 0x346   :  { %v763_v16 = vadd.f32 1.0, %v1466_v10 }
 0x347   :  { %1469 = vrcp.f32 %v723_v36  ;;  %v735_v14 = vand.u32 2147483648, %v723_v36  ;;  %v733_v20 = vand.u32 2147483647, %v723_v36  ;;  %vm729_vm8 = vweird.f32 %v723_v36 }
 0x348   :  { %1471 = vrcp.f32 %v763_v16  ;;  %v775_v18 = vand.u32 2147483648, %v763_v16  ;;  %v773_v22 = vand.u32 2147483647, %v763_v16  ;;  %vm769_vm9 = vweird.f32 %v763_v16 }
 0x349   :  { %v736_v25 = vor.u32 1.1754944e-38, %v735_v14  ;;  %vm734_vm14 = vcmp.eq.f32.partialorder %v733_v20, 8.507059e+37 }
 0x34a   :  { %v776_v29 = vor.u32 1.1754944e-38, %v775_v18  ;;  %vm774_vm15 = vcmp.eq.f32.partialorder %v773_v22, 8.507059e+37 }
 0x34b   :  { %v1468_v55 = vpop.eup %1467 }
 0x34c   :  { %v825_v56 = vadd.f32 1.0, %v1468_v55 }
 0x34d   :  { %v1470_v57 = vpop.eup %1469 }
 0x34e   :  { %v1472_v59 = vpop.eup %1471  ;;  %v725_v60 = vmul.f32 %v1470_v57, %v723_v36  ;;  %1473 = vrcp.f32 %v825_v56  ;;  %vm730_vm6 = vweird.f32 %v1470_v57  ;;  %v837_v41 = vand.u32 2147483648, %v825_v56 }
 0x34f   :  { %v765_v61 = vmul.f32 %v1472_v59, %v763_v16  ;;  %1475 = vtanh.f32 %v799_v58  ;;  %vm770_vm7 = vweird.f32 %v1472_v59  ;;  %vm731_vm10 = vmor %vm729_vm8, %vm730_vm6  ;;  %vm831_vm1 = vweird.f32 %v825_v56 }
 0x350   :  { %v726_v62 = vsub.f32 1.0, %v725_v60  ;;  %vm771_vm11 = vmor %vm769_vm9, %vm770_vm7  ;;  %v835_v42 = vand.u32 2147483647, %v825_v56  ;;  %v838_v44 = vor.u32 1.1754944e-38, %v837_v41 }
 0x351   :  { %v766_v63 = vsub.f32 1.0, %v765_v61 }
 0x352   :  { %v727_v19 = vmul.f32 %v1470_v57, %v726_v62  ;;  %vm836_vm3 = vcmp.eq.f32.partialorder %v835_v42, 8.507059e+37  ;;  %v851_v62 = vld [vmem:[#allocation2 + $0x2c] sm:$0x3] }
 0x353   :  { %v767_v21 = vmul.f32 %v1472_v59, %v766_v63 }
 0x354   :  { %v1474_v23 = vpop.eup %1473  ;;  %v728_v24 = vadd.f32 %v1470_v57, %v727_v19 }
 0x355   :  { %v768_v26 = vadd.f32 %v1472_v59, %v767_v21  ;;  %v827_v28 = vmul.f32 %v1474_v23, %v825_v56  ;;  %v1476_v31 = vpop.eup %1475  ;;  %vm832_vm0 = vweird.f32 %v1474_v23 }
 0x356   :  { %v732_v30 = vsel %vm731_vm10, %v1470_v57, %v728_v24  ;;  %vm833_vm2 = vmor %vm831_vm1, %vm832_vm0 }
 0x357   :  { %v737_v32 = vsel %vm734_vm14, %v736_v25, %v732_v30  ;;  %v772_v33 = vsel %vm771_vm11, %v1472_v59, %v768_v26  ;;  %v828_v34 = vsub.f32 1.0, %v827_v28 }
 0x358   :  { %v777_v35 = vsel %vm774_vm15, %v776_v29, %v772_v33  ;;  %v842_v17 = vmul.f32 %v1476_v31, %v737_v32 }
 0x359   :  { %v841_v37 = vmul.f32 %v777_v35, %v1808_v45  ;;  %v829_v38 = vmul.f32 %v1474_v23, %v828_v34  ;;  %v1527_v45 = vld [vmem:[#allocation5 + $0x18] sm:$0xff] }
 0x35b   :  { %v1833_v39 = vadd.f32 %v842_v17, %v841_v37  ;;  %v830_v40 = vadd.f32 %v1474_v23, %v829_v38 }
 0x35d   :  { %1477 = vtanh.f32 %v1833_v39  ;;  %v834_v43 = vsel %vm833_vm2, %v1474_v23, %v830_v40 }
 0x35e   :  { %v839_v46 = vsel %vm836_vm3, %v838_v44, %v834_v43 }
 0x363   :  { %v1478_v27 = vpop.eup %1477 }
 0x364   :  { %v845_v47 = vmul.f32 %v1478_v27, %v839_v46 }
 0x366   :  { %847 = vst.msk [vmem:[#allocation7 + $0x8] sm:$0x3] %vm218_vm13, %v845_v47  ;;  %1370 = vmatmul.msk.f32.vlgmr.msrb.gmra.mxu0 %vm67_vm12, %v845_v47  ;;  %1372 = vmatmul.msk.f32.vlgmr.msrb.gmra.mxu1 %vm67_vm12, %v845_v47 }
 0x367   :  { %1374 = vmatmul.msk.f32.vlgmr.msrb.gmra.mxu2 %vm67_vm12, %v845_v47  ;;  %1375 = vmatmul.msk.f32.vlgmr.msrb.gmra.mxu3 %vm67_vm12, %v845_v47 }
 0x368   :  { %1182 = vmatpush.msrb.mxu0 %v1527_v45  ;;  %1222 = vmatpush.msrb.mxu1 %v1528_v48 }
 0x369   :  { %1262 = vmatpush.msrb.mxu2 %v1529_v49  ;;  %1284 = vmatpush.msrb.mxu3 %v1530_v50 }
 0x36a   :  { %1183 = vmatpush.msrb.mxu0 %v1531_v51  ;;  %1223 = vmatpush.msrb.mxu1 %v1532_v52 }
 0x36b   :  { %1263 = vmatpush.msrb.mxu2 %v1533_v53  ;;  %1285 = vmatpush.msrb.mxu3 %v1534_v0 }
 0x36c   :  { %1184 = vmatpush.msrb.mxu0 %v1535_v1  ;;  %1224 = vmatpush.msrb.mxu1 %v1536_v2 }
 0x36d   :  { %1264 = vmatpush.msrb.mxu2 %v1537_v3  ;;  %1286 = vmatpush.msrb.mxu3 %v1538_v4  ;;  %v1007_v3 = vld [vmem:[#allocation2 + $0x32] sm:$0x3] }
 0x36e   :  { %1185 = vmatpush.msrb.mxu0 %v1539_v5  ;;  %1225 = vmatpush.msrb.mxu1 %v1540_v6 }
 0x36f   :  { %1265 = vmatpush.msrb.mxu2 %v1541_v7  ;;  %1287 = vmatpush.msrb.mxu3 %v1542_v11 }
 0x3e3   :  { %v873_v9 = vpop.f32.mrf.mxu0  ;;  %v913_v15 = vpop.f32.mrf.mxu1 }
 0x3e4   :  { %v876_v10 = vadd.f32 %v873_v9, %v849_v8  ;;  %v916_v36 = vadd.f32 %v913_v15, %v850_v13  ;;  %v1009_v13 = vld [vmem:[#allocation2 + $0x36] sm:$0x3] }
 0x3e6   :  { %v1371_v16 = vmul.f32 -1.442695, %v876_v10  ;;  %v1373_v12 = vmul.f32 -1.442695, %v916_v36 }
 0x3e8   :  { %1479 = vpow2.f32 %v1371_v16 }
 0x3e9   :  { %1481 = vpow2.f32 %v1373_v12 }
 0x3ea   :  { %v975_v55 = vpop.f32.mrf.mxu3  ;;  %v953_v63 = vpop.f32.mrf.mxu2 }
 0x3eb   :  { %v978_v56 = vadd.f32 %v975_v55, %v852_v54  ;;  %v956_v20 = vadd.f32 %v953_v63, %v851_v62  ;;  %v1008_v55 = vld [vmem:[#allocation2 + $0x34] sm:$0x3] }
 0x3ed   :  { %v1376_v57 = vmul.f32 -1.442695, %v978_v56 }
 0x3ee   :  { %v1480_v58 = vpop.eup %1479 }
 0x3ef   :  { %v1482_v59 = vpop.eup %1481  ;;  %v880_v60 = vadd.f32 1.0, %v1480_v58  ;;  %1483 = vpow2.f32 %v1376_v57 }
 0x3f0   :  { %v920_v61 = vadd.f32 1.0, %v1482_v59 }
 0x3f1   :  { %1485 = vrcp.f32 %v880_v60  ;;  %v892_v26 = vand.u32 2147483648, %v880_v60  ;;  %v890_v30 = vand.u32 2147483647, %v880_v60  ;;  %vm886_vm6 = vweird.f32 %v880_v60 }
 0x3f2   :  { %1487 = vrcp.f32 %v920_v61  ;;  %v932_v28 = vand.u32 2147483648, %v920_v61  ;;  %v930_v32 = vand.u32 2147483647, %v920_v61  ;;  %vm926_vm7 = vweird.f32 %v920_v61 }
 0x3f3   :  { %v893_v35 = vor.u32 1.1754944e-38, %v892_v26  ;;  %vm891_vm10 = vcmp.eq.f32.partialorder %v890_v30, 8.507059e+37 }
 0x3f4   :  { %v933_v38 = vor.u32 1.1754944e-38, %v932_v28  ;;  %vm931_vm11 = vcmp.eq.f32.partialorder %v930_v32, 8.507059e+37 }
 0x3f5   :  { %v1484_v14 = vpop.eup %1483 }
 0x3f6   :  { %v982_v18 = vadd.f32 1.0, %v1484_v14 }
 0x3f7   :  { %v1486_v19 = vpop.eup %1485 }
 0x3f8   :  { %v1488_v21 = vpop.eup %1487  ;;  %v882_v22 = vmul.f32 %v1486_v19, %v880_v60  ;;  %1489 = vrcp.f32 %v982_v18  ;;  %vm887_vm4 = vweird.f32 %v1486_v19  ;;  %v994_v50 = vand.u32 2147483648, %v982_v18 }
 0x3f9   :  { %v922_v23 = vmul.f32 %v1488_v21, %v920_v61  ;;  %1491 = vtanh.f32 %v956_v20  ;;  %vm927_vm5 = vweird.f32 %v1488_v21  ;;  %vm888_vm8 = vmor %vm886_vm6, %vm887_vm4  ;;  %vm988_vm15 = vweird.f32 %v982_v18 }
 0x3fa   :  { %v883_v24 = vsub.f32 1.0, %v882_v22  ;;  %vm928_vm9 = vmor %vm926_vm7, %vm927_vm5  ;;  %v992_v51 = vand.u32 2147483647, %v982_v18  ;;  %v995_v53 = vor.u32 1.1754944e-38, %v994_v50 }
 0x3fb   :  { %v923_v25 = vsub.f32 1.0, %v922_v23 }
 0x3fc   :  { %v884_v29 = vmul.f32 %v1486_v19, %v883_v24  ;;  %vm993_vm1 = vcmp.eq.f32.partialorder %v992_v51, 8.507059e+37  ;;  %v1164_v51 = vld [vmem:[#allocation2 + $0x3a] sm:$0x3] }
 0x3fd   :  { %v924_v31 = vmul.f32 %v1488_v21, %v923_v25 }
 0x3fe   :  { %v1490_v33 = vpop.eup %1489  ;;  %v885_v34 = vadd.f32 %v1486_v19, %v884_v29 }
 0x3ff   :  { %v925_v17 = vadd.f32 %v1488_v21, %v924_v31  ;;  %v984_v37 = vmul.f32 %v1490_v33, %v982_v18  ;;  %v1492_v41 = vpop.eup %1491  ;;  %vm989_vm14 = vweird.f32 %v1490_v33 }
 0x400   :  { %v889_v40 = vsel %vm888_vm8, %v1486_v19, %v885_v34  ;;  %vm990_vm0 = vmor %vm988_vm15, %vm989_vm14 }
 0x401   :  { %v894_v42 = vsel %vm891_vm10, %v893_v35, %v889_v40  ;;  %v929_v43 = vsel %vm928_vm9, %v1488_v21, %v925_v17  ;;  %v985_v44 = vsub.f32 1.0, %v984_v37 }
 0x402   :  { %v934_v27 = vsel %vm931_vm11, %v933_v38, %v929_v43  ;;  %v999_v46 = vmul.f32 %v1492_v41, %v894_v42 }
 0x403   :  { %v998_v47 = vmul.f32 %v934_v27, %v1833_v39  ;;  %v986_v45 = vmul.f32 %v1490_v33, %v985_v44  ;;  %v1006_v39 = vld [vmem:[#allocation2 + $0x30] sm:$0x3] }
 0x405   :  { %v1842_v48 = vadd.f32 %v999_v46, %v998_v47  ;;  %v987_v49 = vadd.f32 %v1490_v33, %v986_v45 }
 0x407   :  { %1493 = vtanh.f32 %v1842_v48  ;;  %v991_v52 = vsel %vm990_vm0, %v1490_v33, %v987_v49 }
 0x408   :  { %v996_v1 = vsel %vm993_vm1, %v995_v53, %v991_v52 }
 0x40d   :  { %v1494_v0 = vpop.eup %1493 }
 0x40e   :  { %v1002_v2 = vmul.f32 %v1494_v0, %v996_v1 }
 0x410   :  { %1004 = vst.msk [vmem:[#allocation7 + $0xa] sm:$0x3] %vm218_vm13, %v1002_v2  ;;  %1377 = vmatmul.msk.f32.vlgmr.msra.gmra.mxu0 %vm67_vm12, %v1002_v2  ;;  %1379 = vmatmul.msk.f32.vlgmr.msra.gmra.mxu1 %vm67_vm12, %v1002_v2 }
 0x411   :  { %1381 = vmatmul.msk.f32.vlgmr.msra.gmra.mxu2 %vm67_vm12, %v1002_v2  ;;  %1382 = vmatmul.msk.f32.vlgmr.msra.gmra.mxu3 %vm67_vm12, %v1002_v2 }
 0x48d   :  { %v1030_v4 = vpop.f32.mrf.mxu0  ;;  %v1070_v5 = vpop.f32.mrf.mxu1 }
 0x48e   :  { %v1033_v6 = vadd.f32 %v1030_v4, %v1006_v39  ;;  %v1073_v7 = vadd.f32 %v1070_v5, %v1007_v3  ;;  %v1166_v3 = vld [vmem:[#allocation2 + $0x3e] sm:$0x3] }
 0x490   :  { %v1378_v11 = vmul.f32 -1.442695, %v1033_v6  ;;  %v1380_v8 = vmul.f32 -1.442695, %v1073_v7 }
 0x492   :  { %1495 = vpow2.f32 %v1378_v11 }
 0x493   :  { %1497 = vpow2.f32 %v1380_v8 }
 0x494   :  { %v1132_v9 = vpop.f32.mrf.mxu3  ;;  %v1110_v56 = vpop.f32.mrf.mxu2 }
 0x495   :  { %v1135_v15 = vadd.f32 %v1132_v9, %v1009_v13  ;;  %v1113_v60 = vadd.f32 %v1110_v56, %v1008_v55  ;;  %v1165_v9 = vld [vmem:[#allocation2 + $0x3c] sm:$0x3] }
 0x497   :  { %v1383_v10 = vmul.f32 -1.442695, %v1135_v15 }
 0x498   :  { %v1496_v36 = vpop.eup %1495 }
 0x499   :  { %v1498_v16 = vpop.eup %1497  ;;  %v1037_v12 = vadd.f32 1.0, %v1496_v36  ;;  %1499 = vpow2.f32 %v1383_v10 }
 0x49a   :  { %v1077_v54 = vadd.f32 1.0, %v1498_v16 }
 0x49b   :  { %1501 = vrcp.f32 %v1037_v12  ;;  %v1049_v19 = vand.u32 2147483648, %v1037_v12  ;;  %v1047_v22 = vand.u32 2147483647, %v1037_v12  ;;  %vm1043_vm4 = vweird.f32 %v1037_v12 }
 0x49c   :  { %1503 = vrcp.f32 %v1077_v54  ;;  %v1089_v20 = vand.u32 2147483648, %v1077_v54  ;;  %v1087_v24 = vand.u32 2147483647, %v1077_v54  ;;  %vm1083_vm5 = vweird.f32 %v1077_v54 }
 0x49d   :  { %v1050_v28 = vor.u32 1.1754944e-38, %v1049_v19  ;;  %vm1048_vm8 = vcmp.eq.f32.partialorder %v1047_v22, 8.507059e+37 }
 0x49e   :  { %v1090_v31 = vor.u32 1.1754944e-38, %v1089_v20  ;;  %vm1088_vm9 = vcmp.eq.f32.partialorder %v1087_v24, 8.507059e+37 }
 0x49f   :  { %v1500_v57 = vpop.eup %1499 }
 0x4a0   :  { %v1139_v58 = vadd.f32 1.0, %v1500_v57 }
 0x4a1   :  { %v1502_v59 = vpop.eup %1501 }
 0x4a2   :  { %v1504_v61 = vpop.eup %1503  ;;  %v1039_v62 = vmul.f32 %v1502_v59, %v1037_v12  ;;  %1505 = vrcp.f32 %v1139_v58  ;;  %vm1044_vm2 = vweird.f32 %v1502_v59  ;;  %v1151_v44 = vand.u32 2147483648, %v1139_v58 }
 0x4a3   :  { %v1079_v63 = vmul.f32 %v1504_v61, %v1077_v54  ;;  %1507 = vtanh.f32 %v1113_v60  ;;  %vm1084_vm3 = vweird.f32 %v1504_v61  ;;  %vm1045_vm6 = vmor %vm1043_vm4, %vm1044_vm2  ;;  %vm1145_vm11 = vweird.f32 %v1139_v58 }
 0x4a4   :  { %v1040_v14 = vsub.f32 1.0, %v1039_v62  ;;  %vm1085_vm7 = vmor %vm1083_vm5, %vm1084_vm3  ;;  %v1149_v27 = vand.u32 2147483647, %v1139_v58  ;;  %v1152_v47 = vor.u32 1.1754944e-38, %v1151_v44 }
 0x4a5   :  { %v1080_v18 = vsub.f32 1.0, %v1079_v63 }
 0x4a6   :  { %v1041_v21 = vmul.f32 %v1502_v59, %v1040_v14  ;;  %vm1150_vm15 = vcmp.eq.f32.partialorder %v1149_v27, 8.507059e+37 }
 0x4a7   :  { %v1081_v23 = vmul.f32 %v1504_v61, %v1080_v18 }
 0x4a8   :  { %v1506_v25 = vpop.eup %1505  ;;  %v1042_v26 = vadd.f32 %v1502_v59, %v1041_v21 }
 0x4a9   :  { %v1082_v29 = vadd.f32 %v1504_v61, %v1081_v23  ;;  %v1141_v30 = vmul.f32 %v1506_v25, %v1139_v58  ;;  %v1508_v33 = vpop.eup %1507  ;;  %vm1146_vm10 = vweird.f32 %v1506_v25 }
 0x4aa   :  { %v1046_v32 = vsel %vm1045_vm6, %v1502_v59, %v1042_v26  ;;  %vm1147_vm14 = vmor %vm1145_vm11, %vm1146_vm10 }
 0x4ab   :  { %v1051_v34 = vsel %vm1048_vm8, %v1050_v28, %v1046_v32  ;;  %v1086_v35 = vsel %vm1085_vm7, %v1504_v61, %v1082_v29  ;;  %v1142_v17 = vsub.f32 1.0, %v1141_v30 }
 0x4ac   :  { %v1091_v37 = vsel %vm1088_vm9, %v1090_v31, %v1086_v35  ;;  %v1156_v38 = vmul.f32 %v1508_v33, %v1051_v34 }
 0x4ad   :  { %v1155_v40 = vmul.f32 %v1091_v37, %v1842_v48  ;;  %v1143_v41 = vmul.f32 %v1506_v25, %v1142_v17  ;;  %v1163_v48 = vld [vmem:[#allocation2 + $0x38] sm:$0x3] }
 0x4af   :  { %v1851_v42 = vadd.f32 %v1156_v38, %v1155_v40  ;;  %v1144_v43 = vadd.f32 %v1506_v25, %v1143_v41 }
 0x4b1   :  { %1509 = vtanh.f32 %v1851_v42  ;;  %v1148_v46 = vsel %vm1147_vm14, %v1506_v25, %v1144_v43 }
 0x4b2   :  { %v1153_v49 = vsel %vm1150_vm15, %v1152_v47, %v1148_v46 }
 0x4b7   :  { %v1510_v45 = vpop.eup %1509 }
 0x4b8   :  { %v1159_v50 = vmul.f32 %v1510_v45, %v1153_v49 }
 0x4ba   :  { %1161 = vst.msk [vmem:[#allocation7 + $0xc] sm:$0x3] %vm218_vm13, %v1159_v50  ;;  %1384 = vmatmul.msk.f32.vlgmr.msrb.gmra.mxu0 %vm67_vm12, %v1159_v50  ;;  %1386 = vmatmul.msk.f32.vlgmr.msrb.gmra.mxu1 %vm67_vm12, %v1159_v50 }
 0x4bb   :  { %1388 = vmatmul.msk.f32.vlgmr.msrb.gmra.mxu2 %vm67_vm12, %v1159_v50  ;;  %1389 = vmatmul.msk.f32.vlgmr.msrb.gmra.mxu3 %vm67_vm12, %v1159_v50 }
 0x537   :  { %v1187_v52 = vpop.f32.mrf.mxu0  ;;  %v1227_v53 = vpop.f32.mrf.mxu1 }
 0x538   :  { %v1190_v0 = vadd.f32 %v1187_v52, %v1163_v48  ;;  %v1230_v1 = vadd.f32 %v1227_v53, %v1164_v51 }
 0x53a   :  { %v1385_v2 = vmul.f32 -1.442695, %v1190_v0  ;;  %v1387_v39 = vmul.f32 -1.442695, %v1230_v1 }
 0x53c   :  { %1511 = vpow2.f32 %v1385_v2 }
 0x53d   :  { %1513 = vpow2.f32 %v1387_v39 }
 0x53e   :  { %v1289_v4 = vpop.f32.mrf.mxu3  ;;  %v1267_v15 = vpop.f32.mrf.mxu2 }
 0x53f   :  { %v1292_v5 = vadd.f32 %v1289_v4, %v1166_v3  ;;  %v1270_v12 = vadd.f32 %v1267_v15, %v1165_v9 }
 0x541   :  { %v1390_v6 = vmul.f32 -1.442695, %v1292_v5 }
 0x542   :  { %v1512_v7 = vpop.eup %1511 }
 0x543   :  { %v1514_v11 = vpop.eup %1513  ;;  %v1194_v8 = vadd.f32 1.0, %v1512_v7  ;;  %1515 = vpow2.f32 %v1390_v6 }
 0x544   :  { %v1234_v13 = vadd.f32 1.0, %v1514_v11 }
 0x545   :  { %1517 = vrcp.f32 %v1194_v8  ;;  %v1206_v59 = vand.u32 2147483648, %v1194_v8  ;;  %v1204_v62 = vand.u32 2147483647, %v1194_v8  ;;  %vm1200_vm1 = vweird.f32 %v1194_v8 }
 0x546   :  { %1519 = vrcp.f32 %v1234_v13  ;;  %v1246_v60 = vand.u32 2147483648, %v1234_v13  ;;  %v1244_v14 = vand.u32 2147483647, %v1234_v13  ;;  %vm1240_vm2 = vweird.f32 %v1234_v13 }
 0x547   :  { %v1207_v20 = vor.u32 1.1754944e-38, %v1206_v59  ;;  %vm1205_vm5 = vcmp.eq.f32.partialorder %v1204_v62, 8.507059e+37 }
 0x548   :  { %v1247_v23 = vor.u32 1.1754944e-38, %v1246_v60  ;;  %vm1245_vm6 = vcmp.eq.f32.partialorder %v1244_v14, 8.507059e+37 }
 0x549   :  { %v1516_v10 = vpop.eup %1515 }
 0x54a   :  { %v1296_v36 = vadd.f32 1.0, %v1516_v10 }
 0x54b   :  { %v1518_v16 = vpop.eup %1517 }
 0x54c   :  { %v1520_v54 = vpop.eup %1519  ;;  %v1196_v55 = vmul.f32 %v1518_v16, %v1194_v8  ;;  %1521 = vrcp.f32 %v1296_v36  ;;  %vm1201_vm12 = vweird.f32 %v1518_v16  ;;  %v1308_v17 = vand.u32 2147483648, %v1296_v36 }
 0x54d   :  { %v1236_v56 = vmul.f32 %v1520_v54, %v1234_v13  ;;  %1523 = vtanh.f32 %v1270_v12  ;;  %vm1241_vm0 = vweird.f32 %v1520_v54  ;;  %vm1202_vm3 = vmor %vm1200_vm1, %vm1201_vm12  ;;  %vm1302_vm8 = vweird.f32 %v1296_v36 }
 0x54e   :  { %v1197_v57 = vsub.f32 1.0, %v1196_v55  ;;  %vm1242_vm4 = vmor %vm1240_vm2, %vm1241_vm0  ;;  %v1306_v37 = vand.u32 2147483647, %v1296_v36  ;;  %v1309_v40 = vor.u32 1.1754944e-38, %v1308_v17 }
 0x54f   :  { %v1237_v58 = vsub.f32 1.0, %v1236_v56 }
 0x550   :  { %v1198_v61 = vmul.f32 %v1518_v16, %v1197_v57  ;;  %vm1307_vm10 = vcmp.eq.f32.partialorder %v1306_v37, 8.507059e+37 }
 0x551   :  { %v1238_v63 = vmul.f32 %v1520_v54, %v1237_v58 }
 0x552   :  { %v1522_v18 = vpop.eup %1521  ;;  %v1199_v19 = vadd.f32 %v1518_v16, %v1198_v61 }
 0x553   :  { %v1239_v21 = vadd.f32 %v1520_v54, %v1238_v63  ;;  %v1298_v22 = vmul.f32 %v1522_v18, %v1296_v36  ;;  %v1524_v25 = vpop.eup %1523  ;;  %vm1303_vm7 = vweird.f32 %v1522_v18 }
 0x554   :  { %v1203_v24 = vsel %vm1202_vm3, %v1518_v16, %v1199_v19  ;;  %vm1304_vm9 = vmor %vm1302_vm8, %vm1303_vm7 }
 0x555   :  { %v1208_v26 = vsel %vm1205_vm5, %v1207_v20, %v1203_v24  ;;  %v1243_v28 = vsel %vm1242_vm4, %v1520_v54, %v1239_v21  ;;  %v1299_v29 = vsub.f32 1.0, %v1298_v22 }
 0x556   :  { %v1248_v30 = vsel %vm1245_vm6, %v1247_v23, %v1243_v28  ;;  %v1313_v31 = vmul.f32 %v1524_v25, %v1208_v26 }
 0x557   :  { %v1312_v32 = vmul.f32 %v1248_v30, %v1851_v42  ;;  %v1300_v33 = vmul.f32 %v1522_v18, %v1299_v29 }
 0x559   :  { %v1314_v34 = vadd.f32 %v1313_v31, %v1312_v32  ;;  %v1301_v35 = vadd.f32 %v1522_v18, %v1300_v33 }
 0x55b   :  { %1525 = vtanh.f32 %v1314_v34  ;;  %v1305_v38 = vsel %vm1304_vm9, %v1522_v18, %v1301_v35 }
 0x55c   :  { %v1310_v42 = vsel %vm1307_vm10, %v1309_v40, %v1305_v38 }
 0x561   :  { %v1526_v41 = vpop.eup %1525 }
 0x562   :  { %v1316_v43 = vmul.f32 %v1526_v41, %v1310_v42 }
 0x564   :  { %1318 = vst.msk [vmem:[#allocation7 + $0xe] sm:$0x3] %vm218_vm13, %v1316_v43 }
 0x565   :  { %1331 = dma.vmem_to_hbm [thread:$0]  %s1324_s22, 256, %s1326_s25, [#allocation4], %s1622_s17, %s1622_s17, %s1623_s18  }
 0x566   :  { %1619 = dma.done.wait [#allocation4], 256  }
 0x567   :  { %1620 = vsyncadd [#allocation4], 4294967040 }
 0x568   :  { %1336 = vsyncpa [#allocation3], 1 }
 0x569   :  { %1337 = vsyncpa [#allocation6], 1 }
 0x56a   :  { %1338 = vsyncpa [#allocation4], 1 }

</bundles_post_ra>
